<compile_context>
chip_gen: v6e
topology: v6e:2x2x1
jax: 0.10.0
libtpu: 0.0.40
codegen_flags: <defaults>
</compile_context>

<pallas_src>
import jax
import jax.numpy as jnp
from jax import lax
from jax.experimental import pallas as pl
from jax.experimental.pallas import tpu as pltpu


def _rgt(x):
    """Parameter-free relational self-attention + residual + LayerNorm.

    x: (B, N, D) f32. Batched; contracts last dims directly (no explicit x.T).
    MXU operands in bf16, accumulation and elementwise math in f32.
    """
    d = x.shape[-1]
    x_bf = x.astype(jnp.bfloat16)
    # fold 1/sqrt(D) into one operand (scale in f32 before the bf16 cast)
    xs_bf = (x * (float(d) ** -0.5)).astype(jnp.bfloat16)
    scores = lax.dot_general(
        xs_bf, x_bf,
        dimension_numbers=(((2,), (2,)), ((0,), (0,))),
        preferred_element_type=jnp.float32)                          # (B, N, N) f32
    scores = scores - jnp.max(scores, axis=-1, keepdims=True)
    p = jnp.exp(scores)
    p = p * pl.reciprocal(jnp.sum(p, axis=-1, keepdims=True), approx=True)
    attn = lax.dot_general(
        p.astype(jnp.bfloat16), x_bf,
        dimension_numbers=(((2,), (1,)), ((0,), (0,))),
        preferred_element_type=jnp.float32)                          # (B, N, D) f32
    h = x + attn
    mu = jnp.mean(h, axis=-1, keepdims=True)
    var = jnp.mean((h - mu) ** 2, axis=-1, keepdims=True)
    return (h - mu) * lax.rsqrt(var + 1e-5)


def generator_kernel(emp_ref, his_ref, gen_ref,
                     wg_ref, bg_ref, wa_ref, pos_ref,
                     w1_ref, b1_ref, w2_ref, b2_ref,
                     wce_ref, wcf_ref, bc_ref,
                     o_ref):
    his = his_ref[...].astype(jnp.float32)          # (Bt, H, D)
    gen = gen_ref[...].astype(jnp.float32)          # (Bt, K, D)
    H = his.shape[1]

    # ---- RGTransformer on each sequence (no concat, no scratch round-trip)
    x_his = _rgt(his)                               # (Bt, H, D) f32
    x_gen = _rgt(gen)                               # (Bt, K, D) f32

    # ---- GatedCrossAttention: gated attention pooling, joint softmax over S = H + K
    wg = wg_ref[...]                                # (D, D) bf16
    bg = bg_ref[...]                                # (1, D) f32

    def gate_of(x):
        return jax.nn.sigmoid(
            lax.dot_general(x.astype(jnp.bfloat16), wg,
                            dimension_numbers=(((2,), (0,)), ((), ())),
                            preferred_element_type=jnp.float32) + bg)

    gate_his = gate_of(x_his)                       # (Bt, H, D)
    gate_gen = gate_of(x_gen)                       # (Bt, K, D)

    wa = wa_ref[...]                                # (1, D) f32
    pos = pos_ref[...]                              # (1, S) f32, lane-major
    # width-1 projection as a VPU reduce; logits kept lane-dense as (Bt, H)/(Bt, K)
    logit_his = jnp.sum(x_his * wa, axis=-1) + pos[:, :H]
    logit_gen = jnp.sum(x_gen * wa, axis=-1) + pos[:, H:]
    m = jnp.maximum(jnp.max(logit_his, axis=-1, keepdims=True),
                    jnp.max(logit_gen, axis=-1, keepdims=True))      # (Bt, 1)
    e_his = jnp.exp(logit_his - m)
    e_gen = jnp.exp(logit_gen - m)
    denom = (jnp.sum(e_his, axis=-1, keepdims=True)
             + jnp.sum(e_gen, axis=-1, keepdims=True))
    inv = pl.reciprocal(denom, approx=True)                          # (Bt, 1)
    w_his = e_his * inv
    w_gen = e_gen * inv
    pooled = (jnp.sum(w_his[:, :, None] * gate_his * x_his, axis=1)
              + jnp.sum(w_gen[:, :, None] * gate_gen * x_gen, axis=1))  # (Bt, D)

    # ---- SelfFusion: tanh(f W1 + b1) W2 + b2 + f
    f = pooled
    h1 = jnp.tanh(jnp.dot(f.astype(jnp.bfloat16), w1_ref[...],
                          preferred_element_type=jnp.float32) + b1_ref[...])
    sf = jnp.dot(h1.astype(jnp.bfloat16), w2_ref[...],
                 preferred_element_type=jnp.float32) + b2_ref[...] + f

    # ---- ConcatClassify: [employee, sf] @ Wc + bc, with Wc split (no concat),
    #      output lane-padded to a multiple of 128 -> unmasked store.
    e_emp = emp_ref[...].astype(jnp.float32)        # (Bt, E)
    out = (jnp.dot(sf.astype(jnp.bfloat16), wcf_ref[...],
                   preferred_element_type=jnp.float32)
           + jnp.dot(e_emp.astype(jnp.bfloat16), wce_ref[...],
                     preferred_element_type=jnp.float32)
           + bc_ref[...])
    o_ref[...] = out.astype(o_ref.dtype)


def _vmem_budget_bytes(bt, H, K, D, S, E, o_pad):
    """Rough scoped-VMEM budget with headroom; v5e's default is only 16 MiB."""
    f32 = 4
    acts = bt * (H + K) * D * f32 * 6               # x, attn, gate, weighted temporaries
    scores = bt * (H * H + K * K) * f32 * 2         # scores + p
    weights = (3 * D * D + E * o_pad + D * o_pad) * 2 + (4 * D + S + o_pad) * f32
    est = 2 * (acts + scores + weights)             # double-buffer headroom
    return int(min(max(est, 32 * 2**20), 64 * 2**20))


def generator_forward(params, employee, historical, generated, *, out_dim):
    B, H, D = historical.shape
    K = generated.shape[1]
    S = H + K
    E = employee.shape[-1]
    o_pad = params["bc"].shape[-1]                  # lane-padded output width

    # Batch tile: full batch when small, otherwise the largest divisor <= 8 so every
    # block is full (no partial-block masking). The batch axis is "parallel" so v7x's
    # second TensorCore picks up half the grid and input DMAs double-buffer.
    if B <= 8:
        bt = B
    else:
        bt = 8
        while B % bt:
            bt -= 1
    grid = (B // bt,)

    def rep(shape):                                 # weights replicated across the grid
        return pl.BlockSpec(shape, lambda i, _n=len(shape): (0,) * _n)

    in_specs = [
        pl.BlockSpec((bt, E), lambda i: (i, 0)),
        pl.BlockSpec((bt, H, D), lambda i: (i, 0, 0)),
        pl.BlockSpec((bt, K, D), lambda i: (i, 0, 0)),
        rep((D, D)), rep((1, D)), rep((1, D)), rep((1, S)),       # wg, bg, wa, pos
        rep((D, D)), rep((1, D)), rep((D, D)), rep((1, D)),       # w1, b1, w2, b2
        rep((E, o_pad)), rep((D, o_pad)), rep((1, o_pad)),        # wce, wcf, bc
    ]
    out_specs = pl.BlockSpec((bt, o_pad), lambda i: (i, 0))

    out = pl.pallas_call(
        generator_kernel,
        out_shape=jax.ShapeDtypeStruct((B, o_pad), jnp.float32),
        grid=grid,
        in_specs=in_specs,
        out_specs=out_specs,
        compiler_params=pltpu.CompilerParams(
            dimension_semantics=("parallel",),
            vmem_limit_bytes=_vmem_budget_bytes(bt, H, K, D, S, E, o_pad)),
    )(employee, historical, generated,
      params["wg"], params["bg"], params["wa"], params["pos"],
      params["w1"], params["b1"], params["w2"], params["b2"],
      params["wce"], params["wcf"], params["bc"])
    return out[:, :out_dim]                         # drop lane padding outside the kernel


def init_params(key, total_games_his, k, embed_dim, employee_dim, total_games_out):
    D, E, O, S = embed_dim, employee_dim, total_games_out, k + total_games_his
    o_pad = max(128, ((O + 127) // 128) * 128)      # lane-dense classifier output
    ks = jax.random.split(key, 9)
    scale = 0.02

    def pad_out(w):
        return jnp.pad(w, ((0, 0), (0, o_pad - O)))

    return {
        # GatedCrossAttention  (matmul weights bf16 once at init; biases/vectors f32)
        "wg":  (scale * jax.random.normal(ks[0], (D, D), jnp.float32)).astype(jnp.bfloat16),
        "bg":  jnp.zeros((1, D), jnp.float32),
        "wa":  scale * jax.random.normal(ks[1], (1, D), jnp.float32),   # row vector
        "pos": scale * jax.random.normal(ks[2], (1, S), jnp.float32),   # lane-major
        # SelfFusion
        "w1":  (scale * jax.random.normal(ks[3], (D, D), jnp.float32)).astype(jnp.bfloat16),
        "b1":  jnp.zeros((1, D), jnp.float32),
        "w2":  (scale * jax.random.normal(ks[4], (D, D), jnp.float32)).astype(jnp.bfloat16),
        "b2":  jnp.zeros((1, D), jnp.float32),
        # ConcatClassify (weight split into employee / fusion halves, lane-padded)
        "wce": pad_out(scale * jax.random.normal(ks[5], (E, O), jnp.float32)).astype(jnp.bfloat16),
        "wcf": pad_out(scale * jax.random.normal(ks[6], (D, O), jnp.float32)).astype(jnp.bfloat16),
        "bc":  jnp.zeros((1, o_pad), jnp.float32),
    }


if __name__ == "__main__":
    # small, forward-consistent shapes
    B = 2
    total_games_his = 8
    k = 4
    embed_dim = 32                                   # TODO(synk): pad D to 128 at production scale
    employee_dim = 8
    total_games_out = 6

    key = jax.random.PRNGKey(0)
    k_par, k_emp, k_his, k_gen = jax.random.split(key, 4)

    params = init_params(k_par, total_games_his, k, embed_dim,
                         employee_dim, total_games_out)

    employee = jax.random.normal(k_emp, (B, employee_dim), jnp.float32)
    historical = jax.random.normal(k_his, (B, total_games_his, embed_dim), jnp.float32)
    generated = jax.random.normal(k_gen, (B, k, embed_dim), jnp.float32)

    fwd = jax.jit(generator_forward, static_argnames=("out_dim",))
    out = fwd(params, employee, historical, generated, out_dim=total_games_out)
    jax.block_until_ready(out)
    assert out.shape == (B, total_games_out), out.shape
    assert bool(jnp.all(jnp.isfinite(out)))
    print("KERNEL_OK")
</pallas_src>

<mosaic_0001>
module attributes {stable_mosaic.version = 11 : i64} {
  func.func @generator_kernel(%arg0: i32, %arg1: memref<2x8xf32, #tpu.memory_space<vmem>>, %arg2: memref<2x8x32xf32, #tpu.memory_space<vmem>>, %arg3: memref<2x4x32xf32, #tpu.memory_space<vmem>>, %arg4: memref<32x32xbf16, #tpu.memory_space<vmem>>, %arg5: memref<1x32xf32, #tpu.memory_space<vmem>>, %arg6: memref<1x32xf32, #tpu.memory_space<vmem>>, %arg7: memref<1x12xf32, #tpu.memory_space<vmem>>, %arg8: memref<32x32xbf16, #tpu.memory_space<vmem>>, %arg9: memref<1x32xf32, #tpu.memory_space<vmem>>, %arg10: memref<32x32xbf16, #tpu.memory_space<vmem>>, %arg11: memref<1x32xf32, #tpu.memory_space<vmem>>, %arg12: memref<8x128xbf16, #tpu.memory_space<vmem>>, %arg13: memref<32x128xbf16, #tpu.memory_space<vmem>>, %arg14: memref<1x128xf32, #tpu.memory_space<vmem>>, %arg15: memref<2x128xf32, #tpu.memory_space<vmem>>) attributes {dimension_semantics = [#tpu.dimension_semantics<parallel>], iteration_bounds = array<i64: 1>, scalar_prefetch = 0 : i64, scratch_operands = 0 : i64, tpu.core_type = #tpu.core_type<tc>, window_params = [{transform_indices = @transform_0, window_bounds = array<i64: 2, 8>}, {transform_indices = @transform_1, window_bounds = array<i64: 2, 8, 32>}, {transform_indices = @transform_2, window_bounds = array<i64: 2, 4, 32>}, {pipeline_mode = #tpu.pipeline_mode<synchronous>, transform_indices = @transform_3, window_bounds = array<i64: 32, 32>}, {pipeline_mode = #tpu.pipeline_mode<synchronous>, transform_indices = @transform_4, window_bounds = array<i64: 1, 32>}, {pipeline_mode = #tpu.pipeline_mode<synchronous>, transform_indices = @transform_5, window_bounds = array<i64: 1, 32>}, {pipeline_mode = #tpu.pipeline_mode<synchronous>, transform_indices = @transform_6, window_bounds = array<i64: 1, 12>}, {pipeline_mode = #tpu.pipeline_mode<synchronous>, transform_indices = @transform_7, window_bounds = array<i64: 32, 32>}, {pipeline_mode = #tpu.pipeline_mode<synchronous>, transform_indices = @transform_8, window_bounds = array<i64: 1, 32>}, {pipeline_mode = #tpu.pipeline_mode<synchronous>, transform_indices = @transform_9, window_bounds = array<i64: 32, 32>}, {pipeline_mode = #tpu.pipeline_mode<synchronous>, transform_indices = @transform_10, window_bounds = array<i64: 1, 32>}, {pipeline_mode = #tpu.pipeline_mode<synchronous>, transform_indices = @transform_11, window_bounds = array<i64: 8, 128>}, {pipeline_mode = #tpu.pipeline_mode<synchronous>, transform_indices = @transform_12, window_bounds = array<i64: 32, 128>}, {pipeline_mode = #tpu.pipeline_mode<synchronous>, transform_indices = @transform_13, window_bounds = array<i64: 1, 128>}, {transform_indices = @transform_14, window_bounds = array<i64: 2, 128>}]} {
    %c0 = arith.constant 0 : index
    %c0_0 = arith.constant 0 : index
    %c0_1 = arith.constant 0 : index
    %0 = vector.load %arg2[%c0, %c0_0, %c0_1] : memref<2x8x32xf32, #tpu.memory_space<vmem>>, vector<2x8x32xf32>
    %c0_2 = arith.constant 0 : index
    %c0_3 = arith.constant 0 : index
    %c0_4 = arith.constant 0 : index
    %1 = vector.load %arg3[%c0_2, %c0_3, %c0_4] : memref<2x4x32xf32, #tpu.memory_space<vmem>>, vector<2x4x32xf32>
    %2 = arith.truncf %0 : vector<2x8x32xf32> to vector<2x8x32xbf16>
    %cst = arith.constant 0.176776692 : f32
    %3 = vector.broadcast %cst : f32 to vector<2x8x32xf32>
    %4 = arith.mulf %0, %3 : vector<2x8x32xf32>
    %5 = arith.truncf %4 : vector<2x8x32xf32> to vector<2x8x32xbf16>
    %cst_5 = arith.constant dense<0.000000e+00> : vector<2x8x8xf32>
    %6 = tpu.matmul %5, %2, %cst_5 {dimension_numbers = #tpu.dot_dimension_numbers<[2], [2], [1], [1], [0, 0, 0, 1, 1, 1], [0], [0]>} : vector<2x8x32xbf16>, vector<2x8x32xbf16>, vector<2x8x8xf32> -> vector<2x8x8xf32>
    %cst_6 = arith.constant dense<0xFF800000> : vector<2x8xf32>
    %7 = vector.multi_reduction <maximumf>, %6, %cst_6 [2] : vector<2x8x8xf32> to vector<2x8xf32>
    %8 = vector.shape_cast %7 : vector<2x8xf32> to vector<2x8x1xf32>
    %9 = vector.broadcast %8 : vector<2x8x1xf32> to vector<2x8x8xf32>
    %10 = arith.subf %6, %9 : vector<2x8x8xf32>
    %11 = math.exp %10 : vector<2x8x8xf32>
    %cst_7 = arith.constant dense<0.000000e+00> : vector<2x8xf32>
    %12 = vector.multi_reduction <add>, %11, %cst_7 [2] : vector<2x8x8xf32> to vector<2x8xf32>
    %13 = vector.shape_cast %12 : vector<2x8xf32> to vector<2x8x1xf32>
    %14 = tpu.reciprocal %13 {approx = true} : vector<2x8x1xf32> -> vector<2x8x1xf32>
    %15 = vector.broadcast %14 : vector<2x8x1xf32> to vector<2x8x8xf32>
    %16 = arith.mulf %11, %15 : vector<2x8x8xf32>
    %17 = arith.truncf %16 : vector<2x8x8xf32> to vector<2x8x8xbf16>
    %cst_8 = arith.constant dense<0.000000e+00> : vector<2x8x32xf32>
    %18 = tpu.matmul %17, %2, %cst_8 {dimension_numbers = #tpu.dot_dimension_numbers<[2], [1], [1], [2], [0, 0, 0, 1, 1, 2], [0], [0]>} : vector<2x8x8xbf16>, vector<2x8x32xbf16>, vector<2x8x32xf32> -> vector<2x8x32xf32>
    %19 = arith.addf %0, %18 : vector<2x8x32xf32>
    %cst_9 = arith.constant dense<0.000000e+00> : vector<2x8xf32>
    %20 = vector.multi_reduction <add>, %19, %cst_9 [2] : vector<2x8x32xf32> to vector<2x8xf32>
    %21 = vector.shape_cast %20 : vector<2x8xf32> to vector<2x8x1xf32>
    %cst_10 = arith.constant 3.200000e+01 : f32
    %22 = vector.broadcast %cst_10 : f32 to vector<2x8x1xf32>
    %23 = arith.divf %21, %22 : vector<2x8x1xf32>
    %24 = vector.broadcast %23 : vector<2x8x1xf32> to vector<2x8x32xf32>
    %25 = arith.subf %19, %24 : vector<2x8x32xf32>
    %26 = arith.mulf %25, %25 : vector<2x8x32xf32>
    %cst_11 = arith.constant dense<0.000000e+00> : vector<2x8xf32>
    %27 = vector.multi_reduction <add>, %26, %cst_11 [2] : vector<2x8x32xf32> to vector<2x8xf32>
    %28 = vector.shape_cast %27 : vector<2x8xf32> to vector<2x8x1xf32>
    %cst_12 = arith.constant 3.200000e+01 : f32
    %29 = vector.broadcast %cst_12 : f32 to vector<2x8x1xf32>
    %30 = arith.divf %28, %29 : vector<2x8x1xf32>
    %31 = vector.broadcast %23 : vector<2x8x1xf32> to vector<2x8x32xf32>
    %32 = arith.subf %19, %31 : vector<2x8x32xf32>
    %cst_13 = arith.constant 9.99999974E-6 : f32
    %33 = vector.broadcast %cst_13 : f32 to vector<2x8x1xf32>
    %34 = arith.addf %30, %33 : vector<2x8x1xf32>
    %35 = math.rsqrt %34 : vector<2x8x1xf32>
    %36 = vector.broadcast %35 : vector<2x8x1xf32> to vector<2x8x32xf32>
    %37 = arith.mulf %32, %36 : vector<2x8x32xf32>
    %38 = arith.truncf %1 : vector<2x4x32xf32> to vector<2x4x32xbf16>
    %cst_14 = arith.constant 0.176776692 : f32
    %39 = vector.broadcast %cst_14 : f32 to vector<2x4x32xf32>
    %40 = arith.mulf %1, %39 : vector<2x4x32xf32>
    %41 = arith.truncf %40 : vector<2x4x32xf32> to vector<2x4x32xbf16>
    %cst_15 = arith.constant dense<0.000000e+00> : vector<2x4x4xf32>
    %42 = tpu.matmul %41, %38, %cst_15 {dimension_numbers = #tpu.dot_dimension_numbers<[2], [2], [1], [1], [0, 0, 0, 1, 1, 1], [0], [0]>} : vector<2x4x32xbf16>, vector<2x4x32xbf16>, vector<2x4x4xf32> -> vector<2x4x4xf32>
    %cst_16 = arith.constant dense<0xFF800000> : vector<2x4xf32>
    %43 = vector.multi_reduction <maximumf>, %42, %cst_16 [2] : vector<2x4x4xf32> to vector<2x4xf32>
    %44 = vector.shape_cast %43 : vector<2x4xf32> to vector<2x4x1xf32>
    %45 = vector.broadcast %44 : vector<2x4x1xf32> to vector<2x4x4xf32>
    %46 = arith.subf %42, %45 : vector<2x4x4xf32>
    %47 = math.exp %46 : vector<2x4x4xf32>
    %cst_17 = arith.constant dense<0.000000e+00> : vector<2x4xf32>
    %48 = vector.multi_reduction <add>, %47, %cst_17 [2] : vector<2x4x4xf32> to vector<2x4xf32>
    %49 = vector.shape_cast %48 : vector<2x4xf32> to vector<2x4x1xf32>
    %50 = tpu.reciprocal %49 {approx = true} : vector<2x4x1xf32> -> vector<2x4x1xf32>
    %51 = vector.broadcast %50 : vector<2x4x1xf32> to vector<2x4x4xf32>
    %52 = arith.mulf %47, %51 : vector<2x4x4xf32>
    %53 = arith.truncf %52 : vector<2x4x4xf32> to vector<2x4x4xbf16>
    %cst_18 = arith.constant dense<0.000000e+00> : vector<2x4x32xf32>
    %54 = tpu.matmul %53, %38, %cst_18 {dimension_numbers = #tpu.dot_dimension_numbers<[2], [1], [1], [2], [0, 0, 0, 1, 1, 2], [0], [0]>} : vector<2x4x4xbf16>, vector<2x4x32xbf16>, vector<2x4x32xf32> -> vector<2x4x32xf32>
    %55 = arith.addf %1, %54 : vector<2x4x32xf32>
    %cst_19 = arith.constant dense<0.000000e+00> : vector<2x4xf32>
    %56 = vector.multi_reduction <add>, %55, %cst_19 [2] : vector<2x4x32xf32> to vector<2x4xf32>
    %57 = vector.shape_cast %56 : vector<2x4xf32> to vector<2x4x1xf32>
    %cst_20 = arith.constant 3.200000e+01 : f32
    %58 = vector.broadcast %cst_20 : f32 to vector<2x4x1xf32>
    %59 = arith.divf %57, %58 : vector<2x4x1xf32>
    %60 = vector.broadcast %59 : vector<2x4x1xf32> to vector<2x4x32xf32>
    %61 = arith.subf %55, %60 : vector<2x4x32xf32>
    %62 = arith.mulf %61, %61 : vector<2x4x32xf32>
    %cst_21 = arith.constant dense<0.000000e+00> : vector<2x4xf32>
    %63 = vector.multi_reduction <add>, %62, %cst_21 [2] : vector<2x4x32xf32> to vector<2x4xf32>
    %64 = vector.shape_cast %63 : vector<2x4xf32> to vector<2x4x1xf32>
    %cst_22 = arith.constant 3.200000e+01 : f32
    %65 = vector.broadcast %cst_22 : f32 to vector<2x4x1xf32>
    %66 = arith.divf %64, %65 : vector<2x4x1xf32>
    %67 = vector.broadcast %59 : vector<2x4x1xf32> to vector<2x4x32xf32>
    %68 = arith.subf %55, %67 : vector<2x4x32xf32>
    %cst_23 = arith.constant 9.99999974E-6 : f32
    %69 = vector.broadcast %cst_23 : f32 to vector<2x4x1xf32>
    %70 = arith.addf %66, %69 : vector<2x4x1xf32>
    %71 = math.rsqrt %70 : vector<2x4x1xf32>
    %72 = vector.broadcast %71 : vector<2x4x1xf32> to vector<2x4x32xf32>
    %73 = arith.mulf %68, %72 : vector<2x4x32xf32>
    %c0_24 = arith.constant 0 : index
    %c0_25 = arith.constant 0 : index
    %74 = vector.load %arg4[%c0_24, %c0_25] : memref<32x32xbf16, #tpu.memory_space<vmem>>, vector<32x32xbf16>
    %c0_26 = arith.constant 0 : index
    %c0_27 = arith.constant 0 : index
    %75 = vector.load %arg5[%c0_26, %c0_27] : memref<1x32xf32, #tpu.memory_space<vmem>>, vector<1x32xf32>
    %76 = arith.truncf %37 : vector<2x8x32xf32> to vector<2x8x32xbf16>
    %cst_28 = arith.constant dense<0.000000e+00> : vector<2x8x32xf32>
    %77 = tpu.matmul %76, %74, %cst_28 {dimension_numbers = #tpu.dot_dimension_numbers<[2], [0], [0, 1], [1], [0, 0, 0, 1, 1, 1], [], []>} : vector<2x8x32xbf16>, vector<32x32xbf16>, vector<2x8x32xf32> -> vector<2x8x32xf32>
    %78 = vector.shape_cast %75 : vector<1x32xf32> to vector<1x1x32xf32>
    %79 = vector.broadcast %78 : vector<1x1x32xf32> to vector<2x8x32xf32>
    %80 = arith.addf %77, %79 : vector<2x8x32xf32>
    %81 = arith.negf %80 : vector<2x8x32xf32>
    %82 = math.exp %81 : vector<2x8x32xf32>
    %cst_29 = arith.constant 1.000000e+00 : f32
    %83 = vector.broadcast %cst_29 : f32 to vector<2x8x32xf32>
    %84 = arith.addf %83, %82 : vector<2x8x32xf32>
    %85 = arith.divf %83, %84 : vector<2x8x32xf32>
    %86 = arith.truncf %73 : vector<2x4x32xf32> to vector<2x4x32xbf16>
    %cst_30 = arith.constant dense<0.000000e+00> : vector<2x4x32xf32>
    %87 = tpu.matmul %86, %74, %cst_30 {dimension_numbers = #tpu.dot_dimension_numbers<[2], [0], [0, 1], [1], [0, 0, 0, 1, 1, 1], [], []>} : vector<2x4x32xbf16>, vector<32x32xbf16>, vector<2x4x32xf32> -> vector<2x4x32xf32>
    %88 = vector.shape_cast %75 : vector<1x32xf32> to vector<1x1x32xf32>
    %89 = vector.broadcast %88 : vector<1x1x32xf32> to vector<2x4x32xf32>
    %90 = arith.addf %87, %89 : vector<2x4x32xf32>
    %91 = arith.negf %90 : vector<2x4x32xf32>
    %92 = math.exp %91 : vector<2x4x32xf32>
    %cst_31 = arith.constant 1.000000e+00 : f32
    %93 = vector.broadcast %cst_31 : f32 to vector<2x4x32xf32>
    %94 = arith.addf %93, %92 : vector<2x4x32xf32>
    %95 = arith.divf %93, %94 : vector<2x4x32xf32>
    %c0_32 = arith.constant 0 : index
    %c0_33 = arith.constant 0 : index
    %96 = vector.load %arg6[%c0_32, %c0_33] : memref<1x32xf32, #tpu.memory_space<vmem>>, vector<1x32xf32>
    %c0_34 = arith.constant 0 : index
    %c0_35 = arith.constant 0 : index
    %97 = vector.load %arg7[%c0_34, %c0_35] : memref<1x12xf32, #tpu.memory_space<vmem>>, vector<1x12xf32>
    %98 = vector.shape_cast %96 : vector<1x32xf32> to vector<1x1x32xf32>
    %99 = vector.broadcast %98 : vector<1x1x32xf32> to vector<2x8x32xf32>
    %100 = arith.mulf %37, %99 : vector<2x8x32xf32>
    %cst_36 = arith.constant dense<0.000000e+00> : vector<2x8xf32>
    %101 = vector.multi_reduction <add>, %100, %cst_36 [2] : vector<2x8x32xf32> to vector<2x8xf32>
    %102 = vector.extract_strided_slice %97 {offsets = [0, 0], sizes = [1, 8], strides = [1, 1]} : vector<1x12xf32> to vector<1x8xf32>
    %103 = vector.broadcast %102 : vector<1x8xf32> to vector<2x8xf32>
    %104 = arith.addf %101, %103 : vector<2x8xf32>
    %105 = vector.shape_cast %96 : vector<1x32xf32> to vector<1x1x32xf32>
    %106 = vector.broadcast %105 : vector<1x1x32xf32> to vector<2x4x32xf32>
    %107 = arith.mulf %73, %106 : vector<2x4x32xf32>
    %cst_37 = arith.constant dense<0.000000e+00> : vector<2x4xf32>
    %108 = vector.multi_reduction <add>, %107, %cst_37 [2] : vector<2x4x32xf32> to vector<2x4xf32>
    %109 = vector.extract_strided_slice %97 {offsets = [0, 8], sizes = [1, 4], strides = [1, 1]} : vector<1x12xf32> to vector<1x4xf32>
    %110 = vector.broadcast %109 : vector<1x4xf32> to vector<2x4xf32>
    %111 = arith.addf %108, %110 : vector<2x4xf32>
    %cst_38 = arith.constant dense<0xFF800000> : vector<2xf32>
    %112 = vector.multi_reduction <maximumf>, %104, %cst_38 [1] : vector<2x8xf32> to vector<2xf32>
    %113 = vector.shape_cast %112 : vector<2xf32> to vector<2x1xf32>
    %cst_39 = arith.constant dense<0xFF800000> : vector<2xf32>
    %114 = vector.multi_reduction <maximumf>, %111, %cst_39 [1] : vector<2x4xf32> to vector<2xf32>
    %115 = vector.shape_cast %114 : vector<2xf32> to vector<2x1xf32>
    %116 = arith.maximumf %113, %115 : vector<2x1xf32>
    %117 = vector.broadcast %116 : vector<2x1xf32> to vector<2x8xf32>
    %118 = arith.subf %104, %117 : vector<2x8xf32>
    %119 = math.exp %118 : vector<2x8xf32>
    %120 = vector.broadcast %116 : vector<2x1xf32> to vector<2x4xf32>
    %121 = arith.subf %111, %120 : vector<2x4xf32>
    %122 = math.exp %121 : vector<2x4xf32>
    %cst_40 = arith.constant dense<0.000000e+00> : vector<2xf32>
    %123 = vector.multi_reduction <add>, %119, %cst_40 [1] : vector<2x8xf32> to vector<2xf32>
    %124 = vector.shape_cast %123 : vector<2xf32> to vector<2x1xf32>
    %cst_41 = arith.constant dense<0.000000e+00> : vector<2xf32>
    %125 = vector.multi_reduction <add>, %122, %cst_41 [1] : vector<2x4xf32> to vector<2xf32>
    %126 = vector.shape_cast %125 : vector<2xf32> to vector<2x1xf32>
    %127 = arith.addf %124, %126 : vector<2x1xf32>
    %128 = tpu.reciprocal %127 {approx = true} : vector<2x1xf32> -> vector<2x1xf32>
    %129 = vector.broadcast %128 : vector<2x1xf32> to vector<2x8xf32>
    %130 = arith.mulf %119, %129 : vector<2x8xf32>
    %131 = vector.broadcast %128 : vector<2x1xf32> to vector<2x4xf32>
    %132 = arith.mulf %122, %131 : vector<2x4xf32>
    %133 = vector.shape_cast %130 : vector<2x8xf32> to vector<2x8x1xf32>
    %134 = vector.broadcast %133 : vector<2x8x1xf32> to vector<2x8x32xf32>
    %135 = arith.mulf %134, %85 : vector<2x8x32xf32>
    %136 = arith.mulf %135, %37 : vector<2x8x32xf32>
    %cst_42 = arith.constant dense<0.000000e+00> : vector<2x32xf32>
    %137 = vector.multi_reduction <add>, %136, %cst_42 [1] : vector<2x8x32xf32> to vector<2x32xf32>
    %138 = vector.shape_cast %132 : vector<2x4xf32> to vector<2x4x1xf32>
    %139 = vector.broadcast %138 : vector<2x4x1xf32> to vector<2x4x32xf32>
    %140 = arith.mulf %139, %95 : vector<2x4x32xf32>
    %141 = arith.mulf %140, %73 : vector<2x4x32xf32>
    %cst_43 = arith.constant dense<0.000000e+00> : vector<2x32xf32>
    %142 = vector.multi_reduction <add>, %141, %cst_43 [1] : vector<2x4x32xf32> to vector<2x32xf32>
    %143 = arith.addf %137, %142 : vector<2x32xf32>
    %144 = arith.truncf %143 : vector<2x32xf32> to vector<2x32xbf16>
    %c0_44 = arith.constant 0 : index
    %c0_45 = arith.constant 0 : index
    %145 = vector.load %arg8[%c0_44, %c0_45] : memref<32x32xbf16, #tpu.memory_space<vmem>>, vector<32x32xbf16>
    %cst_46 = arith.constant dense<0.000000e+00> : vector<2x32xf32>
    %146 = tpu.matmul %144, %145, %cst_46 {dimension_numbers = #tpu.dot_dimension_numbers<[1], [0], [0], [1], [0, 0, 1, 1], [], []>} : vector<2x32xbf16>, vector<32x32xbf16>, vector<2x32xf32> -> vector<2x32xf32>
    %c0_47 = arith.constant 0 : index
    %c0_48 = arith.constant 0 : index
    %147 = vector.load %arg9[%c0_47, %c0_48] : memref<1x32xf32, #tpu.memory_space<vmem>>, vector<1x32xf32>
    %148 = vector.broadcast %147 : vector<1x32xf32> to vector<2x32xf32>
    %149 = arith.addf %146, %148 : vector<2x32xf32>
    %150 = math.tanh %149 : vector<2x32xf32>
    %151 = arith.truncf %150 : vector<2x32xf32> to vector<2x32xbf16>
    %c0_49 = arith.constant 0 : index
    %c0_50 = arith.constant 0 : index
    %152 = vector.load %arg10[%c0_49, %c0_50] : memref<32x32xbf16, #tpu.memory_space<vmem>>, vector<32x32xbf16>
    %cst_51 = arith.constant dense<0.000000e+00> : vector<2x32xf32>
    %153 = tpu.matmul %151, %152, %cst_51 {dimension_numbers = #tpu.dot_dimension_numbers<[1], [0], [0], [1], [0, 0, 1, 1], [], []>} : vector<2x32xbf16>, vector<32x32xbf16>, vector<2x32xf32> -> vector<2x32xf32>
    %c0_52 = arith.constant 0 : index
    %c0_53 = arith.constant 0 : index
    %154 = vector.load %arg11[%c0_52, %c0_53] : memref<1x32xf32, #tpu.memory_space<vmem>>, vector<1x32xf32>
    %155 = vector.broadcast %154 : vector<1x32xf32> to vector<2x32xf32>
    %156 = arith.addf %153, %155 : vector<2x32xf32>
    %157 = arith.addf %156, %143 : vector<2x32xf32>
    %c0_54 = arith.constant 0 : index
    %c0_55 = arith.constant 0 : index
    %158 = vector.load %arg1[%c0_54, %c0_55] : memref<2x8xf32, #tpu.memory_space<vmem>>, vector<2x8xf32>
    %159 = arith.truncf %157 : vector<2x32xf32> to vector<2x32xbf16>
    %c0_56 = arith.constant 0 : index
    %c0_57 = arith.constant 0 : index
    %160 = vector.load %arg13[%c0_56, %c0_57] : memref<32x128xbf16, #tpu.memory_space<vmem>>, vector<32x128xbf16>
    %cst_58 = arith.constant dense<0.000000e+00> : vector<2x128xf32>
    %161 = tpu.matmul %159, %160, %cst_58 {dimension_numbers = #tpu.dot_dimension_numbers<[1], [0], [0], [1], [0, 0, 1, 1], [], []>} : vector<2x32xbf16>, vector<32x128xbf16>, vector<2x128xf32> -> vector<2x128xf32>
    %162 = arith.truncf %158 : vector<2x8xf32> to vector<2x8xbf16>
    %c0_59 = arith.constant 0 : index
    %c0_60 = arith.constant 0 : index
    %163 = vector.load %arg12[%c0_59, %c0_60] : memref<8x128xbf16, #tpu.memory_space<vmem>>, vector<8x128xbf16>
    %cst_61 = arith.constant dense<0.000000e+00> : vector<2x128xf32>
    %164 = tpu.matmul %162, %163, %cst_61 {dimension_numbers = #tpu.dot_dimension_numbers<[1], [0], [0], [1], [0, 0, 1, 1], [], []>} : vector<2x8xbf16>, vector<8x128xbf16>, vector<2x128xf32> -> vector<2x128xf32>
    %165 = arith.addf %161, %164 : vector<2x128xf32>
    %c0_62 = arith.constant 0 : index
    %c0_63 = arith.constant 0 : index
    %166 = vector.load %arg14[%c0_62, %c0_63] : memref<1x128xf32, #tpu.memory_space<vmem>>, vector<1x128xf32>
    %167 = vector.broadcast %166 : vector<1x128xf32> to vector<2x128xf32>
    %168 = arith.addf %165, %167 : vector<2x128xf32>
    %c0_64 = arith.constant 0 : index
    %c0_65 = arith.constant 0 : index
    %169 = vector.load %arg15[%c0_64, %c0_65] : memref<2x128xf32, #tpu.memory_space<vmem>>, vector<2x128xf32>
    tpu.vector_store %arg15[%c0_64, %c0_65], %168 {strides = array<i32>} : memref<2x128xf32, #tpu.memory_space<vmem>>, vector<2x128xf32>,
    return
  }
  func.func @transform_0(%arg0: i32) -> (i32, i32) {
    %c0_i32 = arith.constant 0 : i32
    %c0_i32_0 = arith.constant 0 : i32
    return %arg0, %c0_i32 : i32, i32
  }
  func.func @transform_1(%arg0: i32) -> (i32, i32, i32) {
    %c0_i32 = arith.constant 0 : i32
    %c0_i32_0 = arith.constant 0 : i32
    %c0_i32_1 = arith.constant 0 : i32
    return %arg0, %c0_i32, %c0_i32_0 : i32, i32, i32
  }
  func.func @transform_2(%arg0: i32) -> (i32, i32, i32) {
    %c0_i32 = arith.constant 0 : i32
    %c0_i32_0 = arith.constant 0 : i32
    %c0_i32_1 = arith.constant 0 : i32
    return %arg0, %c0_i32, %c0_i32_0 : i32, i32, i32
  }
  func.func @transform_3(%arg0: i32) -> (i32, i32) {
    %c0_i32 = arith.constant 0 : i32
    %c0_i32_0 = arith.constant 0 : i32
    %c0_i32_1 = arith.constant 0 : i32
    return %c0_i32, %c0_i32_0 : i32, i32
  }
  func.func @transform_4(%arg0: i32) -> (i32, i32) {
    %c0_i32 = arith.constant 0 : i32
    %c0_i32_0 = arith.constant 0 : i32
    %c0_i32_1 = arith.constant 0 : i32
    return %c0_i32, %c0_i32_0 : i32, i32
  }
  func.func @transform_5(%arg0: i32) -> (i32, i32) {
    %c0_i32 = arith.constant 0 : i32
    %c0_i32_0 = arith.constant 0 : i32
    %c0_i32_1 = arith.constant 0 : i32
    return %c0_i32, %c0_i32_0 : i32, i32
  }
  func.func @transform_6(%arg0: i32) -> (i32, i32) {
    %c0_i32 = arith.constant 0 : i32
    %c0_i32_0 = arith.constant 0 : i32
    %c0_i32_1 = arith.constant 0 : i32
    return %c0_i32, %c0_i32_0 : i32, i32
  }
  func.func @transform_7(%arg0: i32) -> (i32, i32) {
    %c0_i32 = arith.constant 0 : i32
    %c0_i32_0 = arith.constant 0 : i32
    %c0_i32_1 = arith.constant 0 : i32
    return %c0_i32, %c0_i32_0 : i32, i32
  }
  func.func @transform_8(%arg0: i32) -> (i32, i32) {
    %c0_i32 = arith.constant 0 : i32
    %c0_i32_0 = arith.constant 0 : i32
    %c0_i32_1 = arith.constant 0 : i32
    return %c0_i32, %c0_i32_0 : i32, i32
  }
  func.func @transform_9(%arg0: i32) -> (i32, i32) {
    %c0_i32 = arith.constant 0 : i32
    %c0_i32_0 = arith.constant 0 : i32
    %c0_i32_1 = arith.constant 0 : i32
    return %c0_i32, %c0_i32_0 : i32, i32
  }
  func.func @transform_10(%arg0: i32) -> (i32, i32) {
    %c0_i32 = arith.constant 0 : i32
    %c0_i32_0 = arith.constant 0 : i32
    %c0_i32_1 = arith.constant 0 : i32
    return %c0_i32, %c0_i32_0 : i32, i32
  }
  func.func @transform_11(%arg0: i32) -> (i32, i32) {
    %c0_i32 = arith.constant 0 : i32
    %c0_i32_0 = arith.constant 0 : i32
    %c0_i32_1 = arith.constant 0 : i32
    return %c0_i32, %c0_i32_0 : i32, i32
  }
  func.func @transform_12(%arg0: i32) -> (i32, i32) {
    %c0_i32 = arith.constant 0 : i32
    %c0_i32_0 = arith.constant 0 : i32
    %c0_i32_1 = arith.constant 0 : i32
    return %c0_i32, %c0_i32_0 : i32, i32
  }
  func.func @transform_13(%arg0: i32) -> (i32, i32) {
    %c0_i32 = arith.constant 0 : i32
    %c0_i32_0 = arith.constant 0 : i32
    %c0_i32_1 = arith.constant 0 : i32
    return %c0_i32, %c0_i32_0 : i32, i32
  }
  func.func @transform_14(%arg0: i32) -> (i32, i32) {
    %c0_i32 = arith.constant 0 : i32
    %c0_i32_0 = arith.constant 0 : i32
    return %arg0, %c0_i32 : i32, i32
  }
}

</mosaic_0001>

<bundles_post_ra>
// kernel: generator_forward.1
= control target key start
LH: loop header
LB: loop body
LE: loop exit
PB: predicated region body
PF: predicated region fallthrough
CT: control target
= control target key end

     0   :  { %19 = vsyncpa [#allocation3], 0  ;;  %s2170_s0 = inlined_call_operand.hbm [shape: f32[2,8], index: 0, kind: input, shape index: {}]   ;;  %s2171_s1 = inlined_call_operand.vmem [shape: f32[2,8,32], index: 1, kind: input, shape index: {}]   ;;  %s2172_s2 = inlined_call_operand.hbm [shape: f32[2,4,32], index: 2, kind: input, shape index: {}]   ;;  %s2173_s3 = inlined_call_operand.hbm [shape: bf16[32,32], index: 3, kind: input, shape index: {}]   ;;  %s2174_s4 = inlined_call_operand.vmem [shape: f32[1,32], index: 4, kind: input, shape index: {}]   ;;  %s2175_s5 = inlined_call_operand.hbm [shape: f32[1,32], index: 5, kind: input, shape index: {}]   ;;  %s2176_s6 = inlined_call_operand.hbm [shape: f32[1,12], index: 6, kind: input, shape index: {}]   ;;  %s2177_s7 = inlined_call_operand.hbm [shape: bf16[32,32], index: 7, kind: input, shape index: {}]   ;;  %s2178_s8 = inlined_call_operand.hbm [shape: f32[1,32], index: 8, kind: input, shape index: {}]   ;;  %s2179_s9 = inlined_call_operand.hbm [shape: bf16[32,32], index: 9, kind: input, shape index: {}]   ;;  %s2180_s10 = inlined_call_operand.hbm [shape: f32[1,32], index: 10, kind: input, shape index: {}]   ;;  %s2181_s11 = inlined_call_operand.vmem [shape: bf16[8,128], index: 11, kind: input, shape index: {}]   ;;  %s2182_s12 = inlined_call_operand.hbm [shape: bf16[32,128], index: 12, kind: input, shape index: {}]   ;;  %s2183_s13 = inlined_call_operand.hbm [shape: f32[1,128], index: 13, kind: input, shape index: {}]   ;;  %s2184_s14 = inlined_call_operand.hbm [shape: f32[2,128], index: 14, kind: output, shape index: {}]  }
   0x1   :  { %20 = vsyncpa [#allocation6], 0 }
   0x2   :  { %21 = vsyncpa [#allocation9], 0 }
   0x3   :  { %22 = vsyncpa [#allocation12], 0 }
   0x4   :  { %23 = vsyncpa [#allocation15], 0 }
   0x5   :  { %24 = vsyncpa [#allocation18], 0 }
   0x6   :  { %25 = vsyncpa [#allocation4], 0  ;;  %s1847_s29 = smov [#allocation5]  }
   0x7   :  { %s43_s30 = sshll.u32 %s1847_s29, 4  ;;  %s44_s30 = int_to_ptr.vmem [resolvable:$true] %s43_s30 }
   0x8   :  { %s1601_s15 = scalar_lea.vmem %s44_s30, 128  ;;  %p1606_p1 = scmp.lt.s32.totalorder %s44_s30, %s44_s30 }
   0x9   :  { %p1602_p0 = scmp.ne.s32.totalorder %s44_s30, %s1601_s15  ;;  %p1607_p2 = scmp.lt.s32.totalorder %s1601_s15, %s1601_s15 }
   0xb   :  { %p1608_p3 = por %p1607_p2, %p1606_p1 }
   0xd   :  { %p1609_p4 = pnand %p1608_p3, %p1602_p0 }
   0xf   :  { %1612 = shalt.err (!%p1609_p4)
}
  0x10   :  { %s1848_s16 = smov 64   ;;  %s1849_s17 = smov 4  }
  0x11   :  { %49 = dma.hbm_to_vmem [thread:$0]  %s2172_s2, 128, %s44_s30, [#allocation6], %s1848_s16, %s1848_s16, %s1849_s17  }
  0x12   :  { %s1850_s20 = smov [#allocation8]   ;;  %s1851_s22 = smov [#allocation11]  }
  0x13   :  { %s70_s21 = sshll.u32 %s1850_s20, 4  ;;  %s89_s23 = sshll.u32 %s1851_s22, 4  ;;  %s71_s21 = int_to_ptr.vmem [resolvable:$true] %s70_s21  ;;  %s90_s23 = int_to_ptr.vmem [resolvable:$true] %s89_s23 }
  0x14   :  { %s1621_s24 = scalar_lea.vmem %s71_s21, 16  ;;  %s1625_s25 = scalar_lea.vmem %s71_s21, 32 }
  0x15   :  { %p1622_p5 = scmp.ne.s32.totalorder %s71_s21, %s1621_s24  ;;  %p1626_p6 = scmp.lt.s32.totalorder %s71_s21, %s71_s21 }
  0x16   :  { %p1627_p7 = scmp.lt.s32.totalorder %s1625_s25, %s1621_s24 }
  0x18   :  { %p1628_p8 = por %p1627_p7, %p1626_p6 }
  0x1a   :  { %p1629_p9 = pnand %p1628_p8, %p1622_p5 }
  0x1c   :  { %1632 = shalt.err (!%p1629_p9)
}
  0x1d   :  { %73 = dma.hbm_to_vmem [thread:$0]  %s2175_s5, 16, %s71_s21, [#allocation9]  }
  0x1e   :  { %s1641_s28 = scalar_lea.vmem %s90_s23, 256  ;;  %p1646_p11 = scmp.lt.s32.totalorder %s90_s23, %s90_s23 }
  0x1f   :  { %p1642_p10 = scmp.ne.s32.totalorder %s90_s23, %s1641_s28  ;;  %p1647_p12 = scmp.lt.s32.totalorder %s1641_s28, %s1641_s28 }
  0x21   :  { %p1648_p13 = por %p1647_p12, %p1646_p11 }
  0x23   :  { %p1649_p0 = pnand %p1648_p13, %p1642_p10 }
  0x25   :  { %1652 = shalt.err (!%p1649_p0)
}
  0x26   :  { %95 = dma.hbm_to_vmem [thread:$0]  %s2177_s7, 256, %s90_s23, [#allocation12], %s1848_s16, %s1848_s16, %s1849_s17  }
  0x27   :  { %s1852_s30 = smov [#allocation14]   ;;  %s1853_s18 = smov [#allocation17]  }
  0x28   :  { %s111_s15 = sshll.u32 %s1852_s30, 4  ;;  %s135_s5 = sshll.u32 %s1853_s18, 4  ;;  %s112_s15 = int_to_ptr.vmem [resolvable:$true] %s111_s15  ;;  %s136_s5 = int_to_ptr.vmem [resolvable:$true] %s135_s5 }
  0x29   :  { %s1661_s19 = scalar_lea.vmem %s112_s15, 256  ;;  %p1666_p2 = scmp.lt.s32.totalorder %s112_s15, %s112_s15 }
  0x2a   :  { %p1662_p1 = scmp.ne.s32.totalorder %s112_s15, %s1661_s19  ;;  %p1667_p3 = scmp.lt.s32.totalorder %s1661_s19, %s1661_s19 }
  0x2c   :  { %p1668_p4 = por %p1667_p3, %p1666_p2 }
  0x2e   :  { %p1669_p5 = pnand %p1668_p4, %p1662_p1 }
  0x30   :  { %1672 = shalt.err (!%p1669_p5)
}
  0x31   :  { %117 = dma.hbm_to_vmem [thread:$0]  %s2179_s9, 256, %s112_s15, [#allocation15], %s1848_s16, %s1848_s16, %s1849_s17  }
  0x32   :  { %s1681_s7 = scalar_lea.vmem %s136_s5, 256  ;;  %p1686_p7 = scmp.lt.s32.totalorder %s136_s5, %s136_s5 }
  0x33   :  { %p1682_p6 = scmp.ne.s32.totalorder %s136_s5, %s1681_s7  ;;  %p1687_p8 = scmp.lt.s32.totalorder %s1681_s7, %s1681_s7 }
  0x35   :  { %p1688_p9 = por %p1687_p8, %p1686_p7 }
  0x37   :  { %p1689_p10 = pnand %p1688_p9, %p1682_p6 }
  0x39   :  { %1692 = shalt.err (!%p1689_p10)
}
  0x3a   :  { %141 = dma.hbm_to_vmem [thread:$0]  %s2182_s12, 256, %s136_s5, [#allocation18], %s1848_s16, %s1848_s16, %s1849_s17  }
  0x3b   :  { %s1854_s24 = smov [#allocation2]   ;;  %s1855_s26 = smov [#allocation7]  }
  0x3c   :  { %s32_s25 = sshll.u32 %s1854_s24, 4  ;;  %s55_s9 = sshll.u32 %s1855_s26, 4  ;;  %s33_s25 = int_to_ptr.vmem [resolvable:$true] %s32_s25  ;;  %s56_s9 = int_to_ptr.vmem [resolvable:$true] %s55_s9 }
  0x3d   :  { %s1701_s27 = scalar_lea.vmem %s33_s25, 32  ;;  %p1706_p12 = scmp.lt.s32.totalorder %s33_s25, %s33_s25 }
  0x3e   :  { %p1702_p11 = scmp.ne.s32.totalorder %s33_s25, %s1701_s27  ;;  %p1707_p13 = scmp.lt.s32.totalorder %s1701_s27, %s1701_s27 }
  0x40   :  { %p1708_p0 = por %p1707_p13, %p1706_p12 }
  0x42   :  { %p1709_p1 = pnand %p1708_p0, %p1702_p11 }
  0x44   :  { %1712 = shalt.err (!%p1709_p1)
}
  0x45   :  { %35 = dma.hbm_to_vmem [thread:$0]  %s2170_s0, 32, %s33_s25, [#allocation3]  }
  0x46   :  { %s1721_s29 = scalar_lea.vmem %s56_s9, 256  ;;  %p1726_p3 = scmp.lt.s32.totalorder %s56_s9, %s56_s9 }
  0x47   :  { %p1722_p2 = scmp.ne.s32.totalorder %s56_s9, %s1721_s29  ;;  %p1727_p4 = scmp.lt.s32.totalorder %s1721_s29, %s1721_s29 }
  0x49   :  { %p1728_p5 = por %p1727_p4, %p1726_p3 }
  0x4b   :  { %p1729_p6 = pnand %p1728_p5, %p1722_p2 }
  0x4d   :  { %1732 = shalt.err (!%p1729_p6)
}
  0x4e   :  { %61 = dma.hbm_to_vmem [thread:$0]  %s2173_s3, 256, %s56_s9, [#allocation6], %s1848_s16, %s1848_s16, %s1849_s17  }
  0x4f   :  { %s1856_s15 = smov [#allocation10]   ;;  %s1857_s5 = smov [#allocation13]  }
  0x50   :  { %s80_s18 = sshll.u32 %s1856_s15, 4  ;;  %s102_s0 = sshll.u32 %s1857_s5, 4  ;;  %s81_s18 = int_to_ptr.vmem [resolvable:$true] %s80_s18  ;;  %s103_s0 = int_to_ptr.vmem [resolvable:$true] %s102_s0 }
  0x51   :  { %s1741_s19 = scalar_lea.vmem %s81_s18, 16  ;;  %s1745_s20 = scalar_lea.vmem %s81_s18, 32 }
  0x52   :  { %p1742_p7 = scmp.ne.s32.totalorder %s81_s18, %s1741_s19  ;;  %p1746_p8 = scmp.lt.s32.totalorder %s81_s18, %s81_s18 }
  0x53   :  { %p1747_p9 = scmp.lt.s32.totalorder %s1745_s20, %s1741_s19 }
  0x55   :  { %p1748_p10 = por %p1747_p9, %p1746_p8 }
  0x57   :  { %p1749_p11 = pnand %p1748_p10, %p1742_p7 }
  0x59   :  { %1752 = shalt.err (!%p1749_p11)
}
  0x5a   :  { %83 = dma.hbm_to_vmem [thread:$0]  %s2176_s6, 16, %s81_s18, [#allocation9]  }
  0x5b   :  { %s1761_s22 = scalar_lea.vmem %s103_s0, 16  ;;  %s1765_s3 = scalar_lea.vmem %s103_s0, 32 }
  0x5c   :  { %p1762_p12 = scmp.ne.s32.totalorder %s103_s0, %s1761_s22  ;;  %p1766_p13 = scmp.lt.s32.totalorder %s103_s0, %s103_s0 }
  0x5d   :  { %p1767_p0 = scmp.lt.s32.totalorder %s1765_s3, %s1761_s22 }
  0x5f   :  { %p1768_p1 = por %p1767_p0, %p1766_p13 }
  0x61   :  { %p1769_p2 = pnand %p1768_p1, %p1762_p12 }
  0x63   :  { %1772 = shalt.err (!%p1769_p2)
}
  0x64   :  { %105 = dma.hbm_to_vmem [thread:$0]  %s2178_s8, 16, %s103_s0, [#allocation12]  }
  0x65   :  { %s1858_s23 = smov [#allocation16]   ;;  %s1859_s25 = smov [#allocation19]  }
  0x66   :  { %s124_s24 = sshll.u32 %s1858_s23, 4  ;;  %s148_s26 = sshll.u32 %s1859_s25, 4  ;;  %s125_s24 = int_to_ptr.vmem [resolvable:$true] %s124_s24  ;;  %s149_s26 = int_to_ptr.vmem [resolvable:$true] %s148_s26 }
  0x67   :  { %s1781_s9 = scalar_lea.vmem %s125_s24, 16  ;;  %s1785_s6 = scalar_lea.vmem %s125_s24, 32 }
  0x68   :  { %p1782_p3 = scmp.ne.s32.totalorder %s125_s24, %s1781_s9  ;;  %p1786_p4 = scmp.lt.s32.totalorder %s125_s24, %s125_s24 }
  0x69   :  { %p1787_p5 = scmp.lt.s32.totalorder %s1785_s6, %s1781_s9 }
  0x6b   :  { %p1788_p6 = por %p1787_p5, %p1786_p4 }
  0x6d   :  { %p1789_p7 = pnand %p1788_p6, %p1782_p3 }
  0x6f   :  { %1792 = shalt.err (!%p1789_p7)
}
  0x70   :  { %127 = dma.hbm_to_vmem [thread:$0]  %s2180_s10, 16, %s125_s24, [#allocation15]  }
  0x71   :  { %s1801_s2 = scalar_lea.vmem %s149_s26, 16  ;;  %s1805_s8 = scalar_lea.vmem %s149_s26, 32 }
  0x72   :  { %p1802_p8 = scmp.ne.s32.totalorder %s149_s26, %s1801_s2  ;;  %p1806_p9 = scmp.lt.s32.totalorder %s149_s26, %s149_s26 }
  0x73   :  { %p1807_p10 = scmp.lt.s32.totalorder %s1805_s8, %s1801_s2 }
  0x75   :  { %p1808_p11 = por %p1807_p10, %p1806_p9 }
  0x77   :  { %p1809_p12 = pnand %p1808_p11, %p1802_p8 }
  0x79   :  { %1812 = shalt.err (!%p1809_p12)
}
  0x7a   :  { %151 = dma.hbm_to_vmem [thread:$0]  %s2183_s13, 16, %s149_s26, [#allocation18]  }
  0x7b   :  { %1833 = dma.done.wait [#allocation3], 32  }
  0x7c   :  { %1834 = vsyncadd [#allocation3], 4294967264 }
  0x7d   :  { %1835 = dma.done.wait [#allocation6], 384  }
  0x7e   :  { %1836 = vsyncadd [#allocation6], 4294966912 }
  0x7f   :  { %1837 = dma.done.wait [#allocation9], 32  }
  0x80   :  { %1838 = vsyncadd [#allocation9], 4294967264 }
  0x81   :  { %1839 = dma.done.wait [#allocation12], 272  }
  0x82   :  { %1840 = vsyncadd [#allocation12], 4294967024 }
  0x83   :  { %1841 = dma.done.wait [#allocation15], 272  }
  0x84   :  { %1842 = vsyncadd [#allocation15], 4294967024 }
  0x85   :  { %1843 = dma.done.wait [#allocation18], 272  }
  0x86   :  { %1844 = vsyncadd [#allocation18], 4294967024  ;;  %v1860_v0 = vmov 0.0   ;;  %vm1861_vm0 = vmmov 0   ;;  %v1997_v1 = vld [vmem:[%s2171_s1] sm:$0xff]  ;;  %vm196_vm1 = vcmask 261120  }
  0x87   :  { %1419 = vmatprep.subr.bf16.mxu0 %v1860_v0  ;;  %1425 = vmatprep.subr.bf16.mxu1 %v1860_v0  ;;  %v2002_v2 = vld [vmem:[%s2171_s1 + $0x8] sm:$0xff]  ;;  %v190_v3 = vpack.c.bf16 %v1997_v1, %v1997_v1  ;;  %v192_v4 = vmul.f32 0.17677669, %v1997_v1  ;;  %vm289_vm2 = vcmask 64512   ;;  %vm317_vm3 = vcmask 1043456  }
  0x88   :  { %1421 = vmatprep.mubr.msk.bf16.mxu0 %vm1861_vm0, %v1860_v0  ;;  %1427 = vmatprep.mubr.msk.bf16.mxu1 %vm1861_vm0, %v1860_v0  ;;  %v191_v5 = vpack.c.bf16 %v2002_v2, %v2002_v2  ;;  %v193_v6 = vmul.f32 0.17677669, %v2002_v2  ;;  %v2028_v35 = vld [vmem:[#allocation5] sm:$0xf]  ;;  %v2034_v38 = vld [vmem:[#allocation5 + $0x4] sm:$0xf] }
  0x89   :  { %v201_v7 = vsel %vm196_vm1, %v190_v3, 0  ;;  %v194_v9 = vpack.c.bf16 %v192_v4, %v192_v4  ;;  %v318_v31 = vsel %vm317_vm3, %v190_v3, 0  ;;  %v2032_v36 = vpack.c.bf16 %v2028_v35, %v2028_v35 }
  0x8a   :  { %v247_v8 = vsel %vm196_vm1, %v191_v5, 0  ;;  %1420 = vmatpush3.bf16.xpose.msra.mxu0 %v201_v7  ;;  %v195_v10 = vpack.c.bf16 %v193_v6, %v193_v6  ;;  %v363_v32 = vsel %vm317_vm3, %v191_v5, 0  ;;  %v2040_v42 = vpack.c.bf16 %v2034_v38, %v2034_v38 }
  0x8b   :  { %1426 = vmatpush3.bf16.xpose.msra.mxu1 %v247_v8  ;;  %1431 = vmatprep.subr.bf16.mxu0 %v1860_v0  ;;  %v444_v41 = vsel %vm196_vm1, %v2032_v36, 0  ;;  %v436_v44 = vmul.f32 0.17677669, %v2028_v35  ;;  %v437_v49 = vmul.f32 0.17677669, %v2034_v38  ;;  %vm532_vm4 = vcmask 27648  }
  0x8c   :  { %1437 = vmatprep.subr.bf16.mxu1 %v1860_v0  ;;  %v490_v47 = vsel %vm196_vm1, %v2040_v42, 0  ;;  %vm561_vm5 = vcmask 1041408   ;;  %vm557_vm6 = vcmask 31744   ;;  %vm651_vm7 = vcmask 257024  }
  0x8d   :  { %v438_v48 = vpack.c.bf16 %v436_v44, %v436_v44  ;;  %v439_v50 = vpack.c.bf16 %v437_v49, %v437_v49  ;;  %vm896_vm8 = vcmask 1041409   ;;  %vm899_vm9 = vcmask 58368  }
  0x8e   :  { %vm921_vm10 = vcmask 25600  }
  0x91   :  { %1422 = vmatmul.mubr.msk.bf16.vlgmr.msra.gmra.mxu0 %vm196_vm1, %v194_v9 }
  0x92   :  { %1428 = vmatmul.mubr.msk.bf16.vlgmr.msra.gmra.mxu1 %vm196_vm1, %v195_v10  ;;  %1433 = vmatprep.mubr.msk.bf16.mxu0 %vm1861_vm0, %v1860_v0 }
  0x93   :  { %1439 = vmatprep.mubr.msk.bf16.mxu1 %vm1861_vm0, %v1860_v0  ;;  %1432 = vmatpush3.bf16.msra.mxu0 %v318_v31 }
  0x94   :  { %1443 = vmatprep.subr.bf16.mxu0 %v1860_v0  ;;  %1438 = vmatpush3.bf16.msra.mxu1 %v363_v32 }
  0x95   :  { %1449 = vmatprep.subr.bf16.mxu1 %v1860_v0 }
 0x151   :  { %v237_v11 = vpop.f32.mrf.mxu0 }
 0x152   :  { %v283_v12 = vpop.f32.mrf.mxu1  ;;  %v290_v13 = vsel %vm289_vm2, %v237_v11, -inf }
 0x153   :  { %291 = vmax.xlane.f32.xlu0 %v290_v13  ;;  %v1423_v14 = vpop.f32.mrf.mxu0  ;;  %v293_v16 = vsel %vm289_vm2, %v283_v12, -inf }
 0x154   :  { %v1429_v15 = vpop.f32.mrf.mxu1 }
 0x155   :  { %v240_v17 = vpop.f32.mrf.mxu0 }
 0x156   :  { %v286_v18 = vpop.f32.mrf.mxu1 }
 0x157   :  { %294 = vmax.xlane.f32.xlu0 %v293_v16  ;;  %v1424_v19 = vpop.f32.mrf.mxu0 }
 0x158   :  { %v1430_v20 = vpop.f32.mrf.mxu1 }
 0x1dc   :  { %v292_v21 = vpop.xlane.xlu0 %291 }
 0x1dd   :  { %v296_v22 = vsub.f32 %v237_v11, %v292_v21 }
 0x1df   :  { %v298_v23 = vmul.f32 1.442695, %v296_v22  ;;  %v562_v22 = vsel %vm561_vm5, %v2032_v36, 0 }
 0x1e0   :  { %v295_v24 = vpop.xlane.xlu0 %294 }
 0x1e1   :  { %1541 = vpow2.f32 %v298_v23  ;;  %v297_v25 = vsub.f32 %v283_v12, %v295_v24 }
 0x1e3   :  { %v300_v26 = vmul.f32 1.442695, %v297_v25 }
 0x1e5   :  { %1543 = vpow2.f32 %v300_v26 }
 0x1ee   :  { %v1542_v27 = vpop.eup %1541 }
 0x1ef   :  { %v302_v28 = vsel %vm289_vm2, %v1542_v27, 0.0 }
 0x1f0   :  { %303 = vadd.xlane.f32.xlu1 %v302_v28 }
 0x1f2   :  { %v1544_v29 = vpop.eup %1543 }
 0x1f3   :  { %v305_v30 = vsel %vm289_vm2, %v1544_v29, 0.0 }
 0x1f4   :  { %306 = vadd.xlane.f32.xlu1 %v305_v30 }
 0x279   :  { %v304_v33 = vpop.xlane.xlu1 %303 }
 0x27a   :  { %1545 = vrcp.f32 %v304_v33 }
 0x27d   :  { %v307_v34 = vpop.xlane.xlu1 %306 }
 0x27e   :  { %1547 = vrcp.f32 %v307_v34 }
 0x287   :  { %v1546_v37 = vpop.eup %1545 }
 0x288   :  { %v310_v39 = vmul.f32 %v1546_v37, %v1542_v27 }
 0x28a   :  { %v312_v40 = vpack.c.bf16 %v310_v39, %v310_v39 }
 0x28b   :  { %v1548_v43 = vpop.eup %1547 }
 0x28c   :  { %1434 = vmatmul.mubr.msk.bf16.vlgmr.msra.gmra.mxu0 %vm289_vm2, %v312_v40  ;;  %v311_v45 = vmul.f32 %v1548_v43, %v1544_v29 }
 0x28d   :  { %1444 = vmatpush3.bf16.xpose.msra.mxu0 %v444_v41  ;;  %1445 = vmatprep.mubr.msk.bf16.mxu0 %vm1861_vm0, %v1860_v0 }
 0x28e   :  { %v313_v46 = vpack.c.bf16 %v311_v45, %v311_v45  ;;  %1455 = vmatprep.subr.bf16.mxu0 %v1860_v0 }
 0x290   :  { %1440 = vmatmul.mubr.msk.bf16.vlgmr.msra.gmra.mxu1 %vm289_vm2, %v313_v46 }
 0x291   :  { %1450 = vmatpush3.bf16.xpose.msra.mxu1 %v490_v47  ;;  %1451 = vmatprep.mubr.msk.bf16.mxu1 %vm1861_vm0, %v1860_v0 }
 0x292   :  { %1461 = vmatprep.subr.bf16.mxu1 %v1860_v0 }
 0x294   :  { %1446 = vmatmul.mubr.msk.bf16.vlgmr.msra.gmra.mxu0 %vm196_vm1, %v438_v48 }
 0x295   :  { %1457 = vmatprep.mubr.msk.bf16.mxu0 %vm1861_vm0, %v1860_v0  ;;  %1456 = vmatpush3.bf16.msra.mxu0 %v562_v22 }
 0x296   :  { %1467 = vmatprep.subr.bf16.mxu0 %v1860_v0 }
 0x298   :  { %1452 = vmatmul.mubr.msk.bf16.vlgmr.msra.gmra.mxu1 %vm196_vm1, %v439_v50 }
 0x299   :  { %1463 = vmatprep.mubr.msk.bf16.mxu1 %vm1861_vm0, %v1860_v0 }
 0x34c   :  { %v354_v51 = vpop.f32.mrf.mxu0 }
 0x34d   :  { %v405_v15 = vadd.f32 %v354_v51, %v1997_v1  ;;  %v607_v1 = vsel %vm561_vm5, %v2040_v42, 0 }
 0x34e   :  { %v1435_v52 = vpop.f32.mrf.mxu0  ;;  %1462 = vmatpush3.bf16.msra.mxu1 %v607_v1 }
 0x34f   :  { %v407_v20 = vsel %vm196_vm1, %v405_v15, 0.0  ;;  %1475 = vmatprep.subr.bf16.mxu1 %v1860_v0 }
 0x350   :  { %v357_v53 = vpop.f32.mrf.mxu0  ;;  %v399_v54 = vpop.f32.mrf.mxu1 }
 0x351   :  { %v406_v18 = vadd.f32 %v399_v54, %v2002_v2  ;;  %v1533_v53 = vld [vmem:[#allocation7 + $0x8] sm:$0xff]  }
 0x352   :  { %v1436_v55 = vpop.f32.mrf.mxu0  ;;  %v1441_v56 = vpop.f32.mrf.mxu1 }
 0x353   :  { %v410_v21 = vsel %vm196_vm1, %v406_v18, 0.0 }
 0x354   :  { %v402_v57 = vpop.f32.mrf.mxu1  ;;  %v480_v58 = vpop.f32.mrf.mxu0 }
 0x355   :  { %v533_v59 = vsel %vm532_vm4, %v480_v58, -inf }
 0x356   :  { %v1442_v60 = vpop.f32.mrf.mxu1  ;;  %534 = vmax.xlane.f32.xlu0 %v533_v59  ;;  %v1447_v61 = vpop.f32.mrf.mxu0 }
 0x358   :  { %v483_v62 = vpop.f32.mrf.mxu0  ;;  %v526_v63 = vpop.f32.mrf.mxu1 }
 0x359   :  { %v536_v3 = vsel %vm532_vm4, %v526_v63, -inf }
 0x35a   :  { %537 = vmax.xlane.f32.xlu1 %v536_v3  ;;  %v1448_v4 = vpop.f32.mrf.mxu0  ;;  %v1453_v5 = vpop.f32.mrf.mxu1 }
 0x35c   :  { %v529_v6 = vpop.f32.mrf.mxu1 }
 0x35e   :  { %v1454_v7 = vpop.f32.mrf.mxu1 }
 0x3df   :  { %v535_v8 = vpop.xlane.xlu0 %534 }
 0x3e0   :  { %v539_v9 = vsub.f32 %v480_v58, %v535_v8 }
 0x3e2   :  { %v541_v10 = vmul.f32 1.442695, %v539_v9 }
 0x3e3   :  { %v538_v11 = vpop.xlane.xlu1 %537 }
 0x3e4   :  { %1549 = vpow2.f32 %v541_v10  ;;  %v540_v12 = vsub.f32 %v526_v63, %v538_v11  ;;  %v1370_v10 = vld [vmem:[#allocation8] ss:$0 sm:$0xff] }
 0x3e6   :  { %v543_v13 = vmul.f32 1.442695, %v540_v12 }
 0x3e8   :  { %1551 = vpow2.f32 %v543_v13 }
 0x3f1   :  { %v1550_v14 = vpop.eup %1549 }
 0x3f2   :  { %v545_v16 = vsel %vm532_vm4, %v1550_v14, 0.0 }
 0x3f3   :  { %546 = vadd.xlane.f32.xlu0 %v545_v16 }
 0x3f5   :  { %v1552_v17 = vpop.eup %1551 }
 0x3f6   :  { %v548_v19 = vsel %vm532_vm4, %v1552_v17, 0.0 }
 0x3f7   :  { %549 = vadd.xlane.f32.xlu1 %v548_v19  ;;  %408 = vadd.xlane.f32.xlu0 %v407_v20 }
 0x3fb   :  { %411 = vadd.xlane.f32.xlu1 %v410_v21 }
 0x47c   :  { %v547_v2 = vpop.xlane.xlu0 %546 }
 0x47d   :  { %1553 = vrcp.f32 %v547_v2 }
 0x480   :  { %v550_v23 = vpop.xlane.xlu1 %549  ;;  %v409_v30 = vpop.xlane.xlu0 %408 }
 0x481   :  { %1555 = vrcp.f32 %v550_v23  ;;  %v414_v31 = vmul.f32 0.03125, %v409_v30  ;;  %v1862_v23 = vmov 1983009808  }
 0x483   :  { %v416_v33 = vsub.f32 %v405_v15, %v414_v31 }
 0x484   :  { %v412_v32 = vpop.xlane.xlu1 %411 }
 0x485   :  { %v415_v34 = vmul.f32 0.03125, %v412_v32  ;;  %v418_v42 = vmul.f32 %v416_v33, %v416_v33 }
 0x487   :  { %v417_v40 = vsub.f32 %v406_v18, %v415_v34  ;;  %v420_v49 = vsel %vm196_vm1, %v418_v42, 0.0  ;;  %v1371_v42 = vld [vmem:[#allocation10] ss:$0 sm:$0xff] }
 0x489   :  { %v419_v50 = vmul.f32 %v417_v40, %v417_v40 }
 0x48a   :  { %v1554_v24 = vpop.eup %1553 }
 0x48b   :  { %v553_v25 = vmul.f32 %v1554_v24, %v1550_v14  ;;  %v423_v52 = vsel %vm196_vm1, %v419_v50, 0.0  ;;  %v770_v24 = vunpack.c.l.s4 %v1862_v23 }
 0x48d   :  { %v555_v26 = vpack.c.bf16 %v553_v25, %v553_v25  ;;  %v772_v25 = vlaneseq }
 0x48e   :  { %v1556_v27 = vpop.eup %1555 }
 0x48f   :  { %1458 = vmatmul.mubr.msk.bf16.vlgmr.msra.gmra.mxu0 %vm557_vm6, %v555_v26  ;;  %v554_v28 = vmul.f32 %v1556_v27, %v1552_v17 }
 0x490   :  { %1471 = vmatprep.mubr.msk.bf16.mxu0 %vm1861_vm0, %v1860_v0  ;;  %1468 = vmatpush3.bf16.msra.mxu0 %v1533_v53 }
 0x491   :  { %v556_v29 = vpack.c.bf16 %v554_v28, %v554_v28  ;;  %1469 = vmatprep.subr.bf16.mxu0 %v1860_v0  ;;  %v771_v28 = vunpack.c.0.s8 %v770_v24 }
 0x493   :  { %1464 = vmatmul.mubr.msk.bf16.vlgmr.msra.gmra.mxu1 %vm557_vm6, %v556_v29  ;;  %v2103_v29 = vshrl.u32 %v772_v25, 7 }
 0x494   :  { %1479 = vmatprep.mubr.msk.bf16.mxu1 %vm1861_vm0, %v1860_v0  ;;  %1476 = vmatpush3.bf16.msra.mxu1 %v1533_v53 }
 0x495   :  { %1477 = vmatprep.subr.bf16.mxu1 %v1860_v0  ;;  %v774_v34 = vsub.s32 %v771_v28, %v2103_v29 }
 0x54f   :  { %v598_v36 = vpop.f32.mrf.mxu0 }
 0x550   :  { %v649_v37 = vadd.f32 %v598_v36, %v2028_v35 }
 0x551   :  { %v1459_v39 = vpop.f32.mrf.mxu0 }
 0x552   :  { %v652_v41 = vsel %vm651_vm7, %v649_v37, 0.0 }
 0x553   :  { %v643_v43 = vpop.f32.mrf.mxu1  ;;  %653 = vadd.xlane.f32.xlu0 %v652_v41  ;;  %v601_v44 = vpop.f32.mrf.mxu0  ;;  %v1863_v41 = vmov 0  }
 0x554   :  { %v650_v45 = vadd.f32 %v643_v43, %v2034_v38  ;;  %v1534_v38 = vld [vmem:[#allocation7] sm:$0xff]   ;;  %1531 = vset.pattern.permute.xlu1 %v1863_v41  ;;  %1532 = vset.pattern.permute.xlu0 %v1863_v41 }
 0x555   :  { %v1460_v46 = vpop.f32.mrf.mxu0  ;;  %v1465_v47 = vpop.f32.mrf.mxu1  ;;  %1470 = vmatpush3.bf16.msra.mxu0 %v1534_v38  ;;  %1478 = vmatpush3.bf16.msra.mxu1 %v1534_v38 }
 0x556   :  { %v655_v48 = vsel %vm651_vm7, %v650_v45, 0.0  ;;  %1483 = vmatprep.subr.bf16.mxu0 %v1860_v0  ;;  %1491 = vmatprep.subr.bf16.mxu1 %v1860_v0 }
 0x557   :  { %656 = vadd.xlane.f32.xlu1 %v655_v48  ;;  %v646_v51 = vpop.f32.mrf.mxu1  ;;  %421 = vadd.xlane.f32.xlu0 %v420_v49 }
 0x559   :  { %v1466_v35 = vpop.f32.mrf.mxu1 }
 0x55b   :  { %424 = vadd.xlane.f32.xlu1 %v423_v52 }
 0x5dc   :  { %v654_v54 = vpop.xlane.xlu0 %653 }
 0x5dd   :  { %v658_v55 = vmul.f32 0.03125, %v654_v54 }
 0x5df   :  { %v660_v56 = vsub.f32 %v649_v37, %v658_v55 }
 0x5e0   :  { %v657_v57 = vpop.xlane.xlu1 %656  ;;  %v422_v58 = vpop.xlane.xlu0 %421 }
 0x5e1   :  { %v659_v59 = vmul.f32 0.03125, %v657_v57  ;;  %v426_v60 = vmul.f32 0.03125, %v422_v58  ;;  %v662_v61 = vmul.f32 %v660_v56, %v660_v56 }
 0x5e3   :  { %v661_v62 = vsub.f32 %v650_v45, %v659_v59  ;;  %v428_v63 = vadd.f32 1e-05, %v426_v60  ;;  %v664_v3 = vsel %vm651_vm7, %v662_v61, 0.0  ;;  %v887_v59 = vand.u32 127, %v772_v25 }
 0x5e4   :  { %v425_v4 = vpop.xlane.xlu1 %424  ;;  %665 = vadd.xlane.f32.xlu0 %v664_v3 }
 0x5e5   :  { %1557 = vrsqrt.f32 %v428_v63  ;;  %v427_v5 = vmul.f32 0.03125, %v425_v4  ;;  %v663_v6 = vmul.f32 %v661_v62, %v661_v62  ;;  %v890_v61 = vsub.s32 %v887_v59, %v2103_v29  ;;  %v1536_v59 = vld [vmem:[#allocation11] sm:$0xff]  }
 0x5e7   :  { %v429_v7 = vadd.f32 1e-05, %v427_v5  ;;  %v667_v8 = vsel %vm651_vm7, %v663_v6, 0.0 }
 0x5e8   :  { %668 = vadd.xlane.f32.xlu1 %v667_v8 }
 0x5e9   :  { %1559 = vrsqrt.f32 %v429_v7 }
 0x5f2   :  { %v1558_v9 = vpop.eup %1557 }
 0x5f3   :  { %v2088_v11 = vmul.f32 %v1558_v9, %v416_v33 }
 0x5f5   :  { %v844_v12 = vmul.f32 %v1370_v10, %v2088_v11 }
 0x5f6   :  { %v1560_v13 = vpop.eup %1559 }
 0x5f7   :  { %v2091_v14 = vmul.f32 %v1560_v13, %v417_v40  ;;  %v846_v15 = vsel %vm196_vm1, %v844_v12, 0.0  ;;  %v929_v13 = vsub.s32 0, %v2103_v29 }
 0x5f8   :  { %847 = vadd.xlane.f32.xlu0 %v846_v15  ;;  %v933_v15 = vsub.s32 1, %v2103_v29 }
 0x5f9   :  { %v1385_v16 = vpack.c.bf16 %v2091_v14, %v2088_v11  ;;  %v845_v17 = vmul.f32 %v1370_v10, %v2091_v14 }
 0x5fb   :  { %1472 = vmatmul.mubr.msk.bf16.vlgmr.msra.gmra.mxu0 %vm196_vm1, %v1385_v16  ;;  %v849_v18 = vsel %vm196_vm1, %v845_v17, 0.0 }
 0x5fc   :  { %850 = vadd.xlane.f32.xlu1 %v849_v18  ;;  %1487 = vmatprep.mubr.msk.bf16.mxu0 %vm1861_vm0, %v1860_v0 }
 0x66d   :  { %v666_v19 = vpop.xlane.xlu0 %665 }
 0x66e   :  { %v670_v20 = vmul.f32 0.03125, %v666_v19 }
 0x670   :  { %v672_v21 = vadd.f32 1e-05, %v670_v20 }
 0x671   :  { %v669_v22 = vpop.xlane.xlu1 %668 }
 0x672   :  { %1561 = vrsqrt.f32 %v672_v21  ;;  %v671_v1 = vmul.f32 0.03125, %v669_v22 }
 0x674   :  { %v673_v2 = vadd.f32 1e-05, %v671_v1 }
 0x676   :  { %1563 = vrsqrt.f32 %v673_v2 }
 0x67f   :  { %v1562_v26 = vpop.eup %1561 }
 0x680   :  { %v2101_v27 = vmul.f32 %v1562_v26, %v660_v56 }
 0x681   :  { %v848_v47 = vpop.xlane.xlu0 %847 }
 0x682   :  { %v863_v30 = vmul.f32 %v1370_v10, %v2101_v27 }
 0x683   :  { %v1564_v31 = vpop.eup %1563 }
 0x684   :  { %v865_v32 = vsel %vm651_vm7, %v863_v30, 0.0  ;;  %v2107_v33 = vmul.f32 %v1564_v31, %v661_v62 }
 0x685   :  { %866 = vadd.xlane.f32.xlu0 %v865_v32  ;;  %v851_v48 = vpop.xlane.xlu1 %850 }
 0x686   :  { %v864_v36 = vmul.f32 %v1370_v10, %v2107_v33  ;;  %v1366_v37 = vpack.c.bf16 %v2107_v33, %v2101_v27 }
 0x688   :  { %v868_v39 = vsel %vm651_vm7, %v864_v36, 0.0  ;;  %v775_v40 = vrot.slane %v1366_v37, %v774_v34 }
 0x689   :  { %869 = vadd.xlane.f32.xlu1 %v868_v39 }
 0x68a   :  { %1480 = vmatmul.mubr.msk.bf16.vlgmr.msra.gmra.mxu1 %vm196_vm1, %v775_v40 }
 0x68b   :  { %1495 = vmatprep.mubr.msk.bf16.mxu1 %vm1861_vm0, %v1860_v0 }
 0x69a   :  { %873 = vbcast.lane.b32.xlu1 %v1371_v42, 264 }
 0x69b   :  { %858 = vbcast.lane.b32.xlu0 %v1371_v42, 256 }
 0x6bb   :  { %v2117_v43 = vpop.f32.mrf.mxu0 }
 0x6bd   :  { %v1473_v44 = vpop.f32.mrf.mxu0 }
 0x6bf   :  { %v2119_v45 = vpop.f32.mrf.mxu0 }
 0x6c1   :  { %v1474_v46 = vpop.f32.mrf.mxu0 }
 0x70e   :  { %v867_v49 = vpop.xlane.xlu0 %866 }
 0x712   :  { %v870_v50 = vpop.xlane.xlu1 %869  ;;  %v859_v51 = vpop.permute.xlu0 %858 }
 0x713   :  { %v861_v35 = vadd.f32 %v859_v51, %v848_v47  ;;  %v862_v53 = vadd.f32 %v859_v51, %v851_v48 }
 0x715   :  { %881 = vperm.xlu1 %1531, %v861_v35  }
 0x716   :  { %v874_v52 = vpop.permute.xlu1 %873 }
 0x717   :  { %v876_v38 = vadd.f32 %v874_v52, %v867_v49  ;;  %v877_v54 = vadd.f32 %v874_v52, %v870_v50 }
 0x719   :  { %906 = vperm.xlu0 %1532, %v876_v38   ;;  %884 = vperm.xlu1 %1531, %v862_v53  }
 0x71d   :  { %909 = vperm.xlu1 %1531, %v877_v54  }
 0x74a   :  { %v2121_v55 = vpop.f32.mrf.mxu1 }
 0x74c   :  { %v1481_v56 = vpop.f32.mrf.mxu1 }
 0x74e   :  { %v818_v57 = vpop.f32.mrf.mxu1 }
 0x750   :  { %v1482_v58 = vpop.f32.mrf.mxu1 }
 0x751   :  { %v1535_v58 = vld [vmem:[#allocation11 + $0x8] sm:$0xff]  }
 0x752   :  { %1484 = vmatpush3.bf16.msra.mxu0 %v1535_v58 }
 0x753   :  { %1485 = vmatprep.subr.bf16.mxu0 %v1860_v0 }
 0x756   :  { %1486 = vmatpush3.bf16.msra.mxu0 %v1536_v59 }
 0x757   :  { %1499 = vmatprep.subr.bf16.mxu0 %v1860_v0 }
 0x790   :  { %v882_v60 = vpop.permute.xlu1 %881 }
 0x791   :  { %v891_v63 = vrot.slane %v882_v60, %v890_v61  ;;  %v1359_v60 = vld [vmem:[%s2174_s4] ss:$0 sm:$0xff] }
 0x794   :  { %v885_v62 = vpop.permute.xlu1 %884  ;;  %v907_v4 = vpop.permute.xlu0 %906 }
 0x795   :  { %v895_v3 = vrot.slane %v885_v62, %v890_v61  ;;  %v914_v8 = vrot.slane %v907_v4, %v890_v61  ;;  %v746_v62 = vadd.f32 %v1359_v60, %v2117_v43 }
 0x797   :  { %v897_v5 = vsel %vm896_vm8, %v895_v3, %v891_v63  ;;  %v749_v63 = vadd.f32 %v1359_v60, %v2119_v45  ;;  %v1364_v4 = vmul.f32 -1.442695, %v746_v62 }
 0x798   :  { %v910_v6 = vpop.permute.xlu1 %909  ;;  %v900_v7 = vsel %vm899_vm9, %v897_v5, -inf }
 0x799   :  { %v918_v9 = vrot.slane %v910_v6, %v890_v61  ;;  %901 = vmax.xlane.f32.xlu1 %v900_v7  ;;  %v1365_v5 = vmul.f32 -1.442695, %v749_v63 }
 0x79b   :  { %v919_v10 = vsel %vm896_vm8, %v918_v9, %v914_v8 }
 0x79c   :  { %v922_v12 = vsel %vm921_vm10, %v919_v10, -inf }
 0x79d   :  { %923 = vmax.xlane.f32.xlu0 %v922_v12 }
 0x822   :  { %v902_v16 = vpop.xlane.xlu1 %901 }
 0x826   :  { %v924_v17 = vpop.xlane.xlu0 %923 }
 0x827   :  { %v925_v18 = vmax.f32 %v902_v16, %v924_v17 }
 0x829   :  { %v930_v19 = vrot.slane %v925_v18, %v929_v13  ;;  %v934_v20 = vrot.slane %v925_v18, %v933_v15 }
 0x82b   :  { %v937_v21 = vsub.f32 %v861_v35, %v930_v19  ;;  %v938_v22 = vsub.f32 %v862_v53, %v934_v20  ;;  %v944_v1 = vsub.f32 %v877_v54, %v934_v20  ;;  %v943_v2 = vsub.f32 %v876_v38, %v930_v19 }
 0x82d   :  { %v939_v23 = vmul.f32 1.442695, %v937_v21  ;;  %v941_v24 = vmul.f32 1.442695, %v938_v22  ;;  %v947_v25 = vmul.f32 1.442695, %v944_v1 }
 0x82e   :  { %v945_v26 = vmul.f32 1.442695, %v943_v2 }
 0x82f   :  { %1565 = vpow2.f32 %v939_v23 }
 0x830   :  { %1567 = vpow2.f32 %v941_v24 }
 0x831   :  { %1569 = vpow2.f32 %v947_v25 }
 0x832   :  { %1571 = vpow2.f32 %v945_v26 }
 0x83c   :  { %v1566_v28 = vpop.eup %1565 }
 0x83d   :  { %v1568_v30 = vpop.eup %1567  ;;  %952 = vperm.xlu0 %1532, %v1566_v28  }
 0x83e   :  { %955 = vperm.xlu1 %1531, %v1568_v30   ;;  %v1570_v29 = vpop.eup %1569 }
 0x83f   :  { %v1572_v31 = vpop.eup %1571 }
 0x841   :  { %976 = vperm.xlu0 %1532, %v1570_v29  }
 0x842   :  { %973 = vperm.xlu1 %1531, %v1572_v31  }
 0x8b8   :  { %v953_v32 = vpop.permute.xlu0 %952 }
 0x8b9   :  { %v956_v34 = vpop.permute.xlu1 %955  ;;  %v960_v36 = vrot.slane %v953_v32, %v890_v61 }
 0x8ba   :  { %v964_v37 = vrot.slane %v956_v34, %v890_v61 }
 0x8bc   :  { %v977_v39 = vpop.permute.xlu0 %976  ;;  %v965_v40 = vsel %vm896_vm8, %v964_v37, %v960_v36 }
 0x8bd   :  { %v974_v41 = vpop.permute.xlu1 %973  ;;  %v985_v42 = vrot.slane %v977_v39, %v890_v61  ;;  %v967_v44 = vsel %vm899_vm9, %v965_v40, 0.0 }
 0x8be   :  { %v981_v46 = vrot.slane %v974_v41, %v890_v61  ;;  %968 = vadd.xlane.f32.xlu1 %v967_v44  ;;  %v776_v61 = vcombine.low %v1359_v60, %v1359_v60 }
 0x8c0   :  { %v986_v47 = vsel %vm896_vm8, %v985_v42, %v981_v46  ;;  %v816_v3 = vadd.f32 %v2121_v55, %v776_v61 }
 0x8c1   :  { %v988_v48 = vsel %vm921_vm10, %v986_v47, 0.0 }
 0x8c2   :  { %989 = vadd.xlane.f32.xlu0 %v988_v48  ;;  %v822_v6 = vcombine.high %v816_v3, %v816_v3  ;;  %v1368_v7 = vmul.f32 -1.442695, %v816_v3 }
 0x8c4   :  { %v1369_v8 = vmul.f32 -1.442695, %v822_v6 }
 0x947   :  { %v969_v49 = vpop.xlane.xlu1 %968 }
 0x94b   :  { %v990_v50 = vpop.xlane.xlu0 %989 }
 0x94c   :  { %v991_v51 = vadd.f32 %v990_v50, %v969_v49 }
 0x94e   :  { %1573 = vrcp.f32 %v991_v51 }
 0x94f   :  { %1575 = vpow2.f32 %v1364_v4 }
 0x950   :  { %1577 = vpow2.f32 %v1365_v5 }
 0x951   :  { %1579 = vpow2.f32 %v1368_v7  ;;  %v1537_v7 = vld [vmem:[#allocation14 + $0x8] sm:$0xff]  }
 0x952   :  { %1581 = vpow2.f32 %v1369_v8  ;;  %1492 = vmatpush3.bf16.msra.mxu1 %v1537_v7  ;;  %v1538_v8 = vld [vmem:[#allocation14] sm:$0xff]  }
 0x953   :  { %1493 = vmatprep.subr.bf16.mxu1 %v1860_v0 }
 0x956   :  { %1494 = vmatpush3.bf16.msra.mxu1 %v1538_v8 }
 0x957   :  { %1505 = vmatprep.subr.bf16.mxu1 %v1860_v0 }
 0x95b   :  { %v1574_v35 = vpop.eup %1573 }
 0x95c   :  { %v1001_v52 = vrot.slane %v1574_v35, %v933_v15  ;;  %v997_v53 = vrot.slane %v1574_v35, %v929_v13  ;;  %v1576_v9 = vpop.eup %1575 }
 0x95d   :  { %v1578_v10 = vpop.eup %1577  ;;  %v758_v12 = vadd.f32 1.0, %v1576_v9  ;;  %v1220_v9 = vld [vmem:[%s2181_s11] sm:$0xf]  ;;  %s1864_s11 = smov [#allocation20]  }
 0x95e   :  { %v1005_v38 = vmul.f32 %v1568_v30, %v1001_v52  ;;  %v1004_v54 = vmul.f32 %v1566_v28, %v997_v53  ;;  %v1006_v56 = vmul.f32 %v1572_v31, %v997_v53  ;;  %v1007_v57 = vmul.f32 %v1570_v29, %v1001_v52  ;;  %v1580_v13 = vpop.eup %1579  ;;  %s1337_s0 = sshll.u32 %s1864_s11, 4  ;;  %s1338_s0 = int_to_ptr.vmem [resolvable:$true] %s1337_s0 }
 0x95f   :  { %v759_v15 = vadd.f32 1.0, %v1578_v10  ;;  %v1582_v16 = vpop.eup %1581  ;;  %1583 = vrcp.f32 %v758_v12  ;;  %v830_v43 = vadd.f32 1.0, %v1580_v13  ;;  %v1225_v10 = vsel %vm317_vm3, %v1220_v9, 0  ;;  %v1372_v12 = vld [vmem:[#allocation13] ss:$0 sm:$0xff]  ;;  %s1813_s19 = scalar_lea.vmem %s1338_s0, 32  ;;  %p1818_p0 = scmp.lt.s32.totalorder %s1338_s0, %s1338_s0 }
 0x960   :  { %1015 = vperm.xlu1 %1531, %v1005_v38   ;;  %1010 = vperm.xlu0 %1532, %v1004_v54   ;;  %v831_v45 = vadd.f32 1.0, %v1582_v16  ;;  %p1814_p13 = scmp.ne.s32.totalorder %s1338_s0, %s1813_s19  ;;  %p1819_p1 = scmp.lt.s32.totalorder %s1813_s19, %s1813_s19 }
 0x961   :  { %1585 = vrcp.f32 %v759_v15 }
 0x962   :  { %1587 = vrcp.f32 %v830_v43  ;;  %p1820_p2 = por %p1819_p1, %p1818_p0 }
 0x963   :  { %1589 = vrcp.f32 %v831_v45 }
 0x964   :  { %1038 = vperm.xlu1 %1531, %v1006_v56   ;;  %1043 = vperm.xlu0 %1532, %v1007_v57   ;;  %p1821_p3 = pnand %p1820_p2, %p1814_p13 }
 0x96c   :  { %v1584_v55 = vpop.eup %1583 }
 0x96e   :  { %v1586_v17 = vpop.eup %1585 }
 0x96f   :  { %v1588_v22 = vpop.eup %1587 }
 0x970   :  { %v1590_v23 = vpop.eup %1589 }
 0x9db   :  { %v1016_v18 = vpop.permute.xlu1 %1015  ;;  %v1011_v19 = vpop.permute.xlu0 %1010 }
 0x9dc   :  { %v1019_v20 = vmul.f32 %v1586_v17, %v1016_v18  ;;  %v1018_v21 = vmul.f32 %v1584_v55, %v1011_v19  ;;  %v1539_v17 = vld [vmem:[#allocation17 + $0x8] sm:$0xff]   ;;  %v1213_v19 = vld [vmem:[#allocation2] sm:$0x3] }
 0x9de   :  { %v1021_v1 = vmul.f32 %v1019_v20, %v2091_v14  ;;  %v1020_v2 = vmul.f32 %v1018_v21, %v2088_v11  ;;  %v1219_v20 = vpack.c.bf16 %v1213_v19, %v1213_v19  ;;  %v1540_v21 = vld [vmem:[#allocation17] sm:$0xff]  }
 0x9df   :  { %v1039_v24 = vpop.permute.xlu1 %1038  ;;  %v1044_v25 = vpop.permute.xlu0 %1043 }
 0x9e0   :  { %v1029_v26 = vsel %vm196_vm1, %v1021_v1, 0.0  ;;  %v1022_v28 = vsel %vm196_vm1, %v1020_v2, 0.0  ;;  %v1046_v30 = vmul.f32 %v1588_v22, %v1039_v24  ;;  %v1047_v29 = vmul.f32 %v1590_v23, %v1044_v25  ;;  %v1376_v22 = vld [vmem:[#allocation16] ss:$0 sm:$0xff] }
 0x9e1   :  { %v1030_v31 = vrot.slane %v1029_v26, 4  ;;  %v1023_v32 = vrot.slane %v1022_v28, 4 }
 0x9e2   :  { %v1048_v34 = vmul.f32 %v1046_v30, %v2101_v27  ;;  %v1049_v36 = vmul.f32 %v1047_v29, %v2107_v33 }
 0x9e3   :  { %v1031_v37 = vadd.f32 %v1030_v31, %v1029_v26  ;;  %v1024_v39 = vadd.f32 %v1023_v32, %v1022_v28 }
 0x9e4   :  { %v1050_v14 = vsel %vm651_vm7, %v1048_v34, 0.0  ;;  %v1057_v11 = vsel %vm651_vm7, %v1049_v36, 0.0  ;;  %v1384_v34 = vld [vmem:[#allocation19] ss:$0 sm:$0xff] }
 0x9e5   :  { %v1032_v40 = vrot.slane %v1031_v37, 2  ;;  %v1025_v41 = vrot.slane %v1024_v39, 2  ;;  %v1051_v42 = vrot.slane %v1050_v14, 4  ;;  %v1058_v44 = vrot.slane %v1057_v11, 4 }
 0x9e7   :  { %v1033_v46 = vadd.f32 %v1032_v40, %v1031_v37  ;;  %v1026_v47 = vadd.f32 %v1025_v41, %v1024_v39  ;;  %v1052_v48 = vadd.f32 %v1051_v42, %v1050_v14  ;;  %v1059_v49 = vadd.f32 %v1058_v44, %v1057_v11 }
 0x9e9   :  { %v1053_v50 = vrot.slane %v1052_v48, 2  ;;  %v1060_v51 = vrot.slane %v1059_v49, 2  ;;  %v1034_v35 = vrot.slane %v1033_v46, 1  ;;  %v1027_v27 = vrot.slane %v1026_v47, 1 }
 0x9eb   :  { %v1054_v52 = vadd.f32 %v1053_v50, %v1052_v48  ;;  %v1061_v33 = vadd.f32 %v1060_v51, %v1059_v49  ;;  %v1035_v54 = vadd.f32 %v1034_v35, %v1033_v46  ;;  %v1028_v56 = vadd.f32 %v1027_v27, %v1026_v47 }
 0x9ed   :  { %v1055_v53 = vrot.slane %v1054_v52, 1  ;;  %v1062_v38 = vrot.slane %v1061_v33, 1 }
 0x9ef   :  { %v1056_v57 = vadd.f32 %v1055_v53, %v1054_v52  ;;  %v1063_v58 = vadd.f32 %v1062_v38, %v1061_v33 }
 0x9f1   :  { %v1064_v59 = vadd.f32 %v1056_v57, %v1028_v56  ;;  %v1065_v60 = vadd.f32 %v1063_v58, %v1035_v54 }
 0x9f3   :  { %v1066_v61 = vpack.c.bf16 %v1064_v59, %v1064_v59  ;;  %v1067_v62 = vpack.c.bf16 %v1065_v60, %v1065_v60  ;;  %v1210_v63 = vsel %vm896_vm8, %v1065_v60, %v1064_v59 }
 0x9f5   :  { %v1081_v3 = vunpack.c.l.b16 %v1066_v61  ;;  %v1082_v4 = vunpack.c.l.b16 %v1067_v62 }
 0x9f7   :  { %v1083_v5 = vsel %vm896_vm8, %v1082_v4, %v1081_v3 }
 0x9f8   :  { %v1084_v6 = vpack.c.b16 %v1083_v5, %v1083_v5 }
 0x9fa   :  { %1488 = vmatmul.mubr.msk.bf16.vlgmr.msra.gmra.mxu0 %vm196_vm1, %v1084_v6 }
 0x9fb   :  { %1501 = vmatprep.mubr.msk.bf16.mxu0 %vm1861_vm0, %v1860_v0  ;;  %1500 = vmatpush3.bf16.msra.mxu0 %v1225_v10 }
 0xa02   :  { %1502 = vmatmul.mubr.msk.bf16.vlgmr.msra.gmra.mxu0 %vm289_vm2, %v1219_v20 }
 0xaba   :  { %v1134_v13 = vpop.f32.mrf.mxu0 }
 0xabb   :  { %v1135_v15 = vadd.f32 %v1372_v12, %v1134_v13 }
 0xabc   :  { %v1489_v16 = vpop.f32.mrf.mxu0 }
 0xabd   :  { %1591 = vtanh.f32 %v1135_v15 }
 0xabe   :  { %v1137_v43 = vpop.f32.mrf.mxu0 }
 0xac0   :  { %v1490_v45 = vpop.f32.mrf.mxu0 }
 0xac2   :  { %v1261_v30 = vpop.f32.mrf.mxu0 }
 0xac4   :  { %v1503_v29 = vpop.f32.mrf.mxu0 }
 0xac6   :  { %v1264_v31 = vpop.f32.mrf.mxu0 }
 0xaca   :  { %v1592_v55 = vpop.eup %1591 }
 0xacb   :  { %v1141_v18 = vpack.c.bf16 %v1592_v55, %v1592_v55 }
 0xacd   :  { %1496 = vmatmul.mubr.msk.bf16.vlgmr.msra.gmra.mxu1 %vm196_vm1, %v1141_v18 }
 0xace   :  { %1506 = vmatpush3.bf16.msra.mxu1 %v1539_v17  ;;  %1509 = vmatprep.mubr.msk.bf16.mxu1 %vm1861_vm0, %v1860_v0 }
 0xacf   :  { %1507 = vmatprep.subr.bf16.mxu1 %v1860_v0  ;;  %v1504_v0 = vpop.f32.mrf.mxu0 }
 0xad2   :  { %1508 = vmatpush3.bf16.msra.mxu1 %v1540_v21 }
 0xb8d   :  { %v1202_v1 = vpop.f32.mrf.mxu1 }
 0xb8e   :  { %v1203_v2 = vadd.f32 %v1376_v22, %v1202_v1 }
 0xb8f   :  { %v1497_v23 = vpop.f32.mrf.mxu1 }
 0xb90   :  { %v1212_v24 = vadd.f32 %v1210_v63, %v1203_v2 }
 0xb91   :  { %v1205_v25 = vpop.f32.mrf.mxu1 }
 0xb92   :  { %v1214_v26 = vpack.c.bf16 %v1212_v24, %v1212_v24 }
 0xb93   :  { %v1498_v28 = vpop.f32.mrf.mxu1 }
 0xb94   :  { %1510 = vmatmul.mubr.msk.bf16.vlgmr.msra.gmra.mxu1 %vm196_vm1, %v1214_v26 }
 0xc54   :  { %v1316_v32 = vpop.f32.mrf.mxu1 }
 0xc55   :  { %v1317_v36 = vadd.f32 %v1316_v32, %v1261_v30 }
 0xc56   :  { %v1511_v37 = vpop.f32.mrf.mxu1 }
 0xc57   :  { %v1329_v39 = vadd.f32 %v1384_v34, %v1317_v36 }
 0xc58   :  { %v1319_v14 = vpop.f32.mrf.mxu1 }
 0xc59   :  { %1330 = vst [vmem:[#allocation20] sm:$0x3] %v1329_v39 }
 0xc5a   :  { %v1512_v11 = vpop.f32.mrf.mxu1 }
 0xc5b   :  { %1824 = shalt.err (!%p1821_p3)
}
 0xc5c   :  { %1340 = dma.vmem_to_hbm [thread:$0]  %s1338_s0, 32, %s2184_s14, [#allocation4]  }
 0xc5d   :  { %1845 = dma.done.wait [#allocation4], 32  }
 0xc5e   :  { %1846 = vsyncadd [#allocation4], 4294967264 }
 0xc5f   :  { %1344 = vsyncpa [#allocation3], 1 }
 0xc60   :  { %1345 = vsyncpa [#allocation6], 1 }
 0xc61   :  { %1346 = vsyncpa [#allocation9], 1 }
 0xc62   :  { %1347 = vsyncpa [#allocation12], 1 }
 0xc63   :  { %1348 = vsyncpa [#allocation15], 1 }
 0xc64   :  { %1349 = vsyncpa [#allocation18], 1 }
 0xc65   :  { %1350 = vsyncpa [#allocation4], 1 }

</bundles_post_ra>
